<compile_context>
chip_gen: v7x
topology: tpu7x:2x2x1
jax: 0.10.0
libtpu: 0.0.40
codegen_flags: <defaults>
</compile_context>

<pallas_src>
import jax
import jax.numpy as jnp
from jax import lax
from jax.experimental import pallas as pl
from jax.experimental.pallas import tpu as pltpu


def _lstm_kernel(x_ref, wih_ref, whh_ref, b_ref, wfc_ref, bfc_ref,
                 out_ref, xproj_scr, h_scr, c_scr):
    Bp, Hp = h_scr.shape
    TC = x_ref.shape[0] // Bp          # timesteps in this chunk (static)

    @pl.when(pl.program_id(0) == 0)
    def _init():
        h_scr[...] = jnp.zeros_like(h_scr)
        c_scr[...] = jnp.zeros_like(c_scr)

    # Chunk-wide input projection: one (TC*Bp, I) x (I, 4Hp) MXU matmul + fused
    # bias, stored to VMEM scratch so the serial time loop only runs the h@W_hh
    # recurrence.  Operands may be bf16 (wrapper flag); accumulation is f32.
    xproj_scr[...] = (jnp.dot(x_ref[...], wih_ref[...],
                              preferred_element_type=jnp.float32)
                      + b_ref[...])                          # (TC*Bp, 4Hp) f32

    h = h_scr[...]                                           # state carried as vregs
    c = c_scr[...]
    mm_dtype = whh_ref.dtype

    def step(t, carry):
        h, c = carry
        row = pl.multiple_of(t * Bp, Bp)                     # Bp is a multiple of 8
        xg = xproj_scr[pl.ds(row, Bp), :]                    # (Bp, 4Hp) f32
        h_mm = h.astype(mm_dtype)

        # Per-gate dots: EUP (sigmoid/tanh) of gate k overlaps the MXU producing
        # gate k+1; W_hh slabs are re-read from the VMEM ref per dot instead of
        # being held live across the loop.
        def gate(k):
            return xg[:, k * Hp:(k + 1) * Hp] + jnp.dot(
                h_mm, whh_ref[:, k * Hp:(k + 1) * Hp],
                preferred_element_type=jnp.float32)

        # PyTorch gate order [i, f, g, o]; slabs are lane-aligned (Hp % 128 == 0).
        i_g = jax.nn.sigmoid(gate(0))
        f_g = jax.nn.sigmoid(gate(1))
        g_g = jnp.tanh(gate(2))
        o_g = jax.nn.sigmoid(gate(3))
        c_new = f_g * c + i_g * g_g
        h_new = o_g * jnp.tanh(c_new)
        return (h_new, c_new)

    # Unrolled fori_loop: full LLO scheduler visibility, bounded live ranges
    # (a static Python `for` would not bound them and risks spills at large TC/Hp).
    h, c = lax.fori_loop(0, TC, step, (h, c), unroll=True)

    h_scr[...] = h                                           # once per chunk
    c_scr[...] = c

    @pl.when(pl.program_id(0) == pl.num_programs(0) - 1)
    def _head():
        # TODO(synk): Dropout(p=0.2) is identity in eval/inference; a training-mode
        # mask would need pltpu.prng_seed / pltpu.prng_random_bits here.
        logits = jnp.dot(h.astype(wfc_ref.dtype), wfc_ref[...],
                         preferred_element_type=jnp.float32) + bfc_ref[...]
        out_ref[...] = jax.nn.sigmoid(logits)                # lane-dense (Bp, 128) store


def _round_up(x, m):
    return ((x + m - 1) // m) * m


def lstm_model_forward(x, params, *, t_chunk=None, matmul_dtype=jnp.float32,
                       single_buffer_weights=False):
    """x: (B, T, I) float32, batch-first (PyTorch batch_first=True).

    matmul_dtype: jnp.bfloat16 on v6e/v7x feeds the MXU bf16 operands (f32
      accumulation and f32 gate/state math kept either way); loosens agreement
      with the f32 reference to ~1e-2, so the default stays f32 for the test.
    single_buffer_weights: request single-buffered resident weights
      (pipeline_mode=pl.Buffered(1)) — VMEM relief on v7x (64 MiB) at large H.
    """
    w_ih, w_hh, b_ih, b_hh, w_fc, b_fc = params
    B, T, I = x.shape
    H = w_hh.shape[1]
    O = w_fc.shape[0]

    LANE, SUB = 128, 8
    Hp = _round_up(H, LANE)        # lane-aligned gate slabs
    Bp = _round_up(B, SUB)         # full sublane tile
    Op = _round_up(O, LANE)        # lane-dense output slab

    f32 = jnp.float32
    mm = jnp.dtype(matmul_dtype)

    # Chunk of timesteps per grid step (must divide T; padding T would corrupt h).
    # Prefer big chunks: t_chunk*Bp >= 256 fills the MXU M dimension and amortizes
    # the ~0.35us/grid-step overhead; capped by a VMEM budget for x chunk + xproj.
    if t_chunk is None:
        budget = 8 << 20
        t_chunk = 1
        for cand in (256, 128, 64, 32, 16, 8, 4, 2, 1):
            chunk_bytes = cand * Bp * (4 * Hp * 4 + I * mm.itemsize * 2)
            if T % cand == 0 and chunk_bytes <= budget:
                t_chunk = cand
                break
    n_chunks = T // t_chunk

    def pad_gate_rows(w):          # (4H, X) -> (4Hp, X), zero-pad each gate block
        wg = w.reshape(4, H, -1)
        wg = jnp.pad(wg, ((0, 0), (0, Hp - H), (0, 0)))
        return wg.reshape(4 * Hp, -1)

    wih_t = pad_gate_rows(w_ih.astype(f32)).T.astype(mm)                 # (I, 4Hp)
    whh_t = jnp.pad(pad_gate_rows(w_hh.astype(f32)),
                    ((0, 0), (0, Hp - H))).T.astype(mm)                  # (Hp, 4Hp)
    b = jnp.pad((b_ih + b_hh).astype(f32).reshape(4, H),
                ((0, 0), (0, Hp - H))).reshape(1, 4 * Hp)                # (1, 4Hp) f32
    wfc_t = jnp.pad(w_fc.astype(f32).T,
                    ((0, Hp - H), (0, Op - O))).astype(mm)               # (Hp, Op)
    bfc = jnp.pad(b_fc.astype(f32).reshape(1, O), ((0, 0), (0, Op - O)))  # (1, Op)

    # Single small repack of x: time-major, batch padded to a sublane tile,
    # flattened so the chunk projection is a plain 2-D matmul.
    x_tm = jnp.transpose(x.astype(f32), (1, 0, 2))                       # (T, B, I)
    x_tm = jnp.pad(x_tm, ((0, 0), (0, Bp - B), (0, 0)))                  # (T, Bp, I)
    x_flat = x_tm.reshape(T * Bp, I).astype(mm)                          # (T*Bp, I)

    def w_spec(shape):
        kw = {"pipeline_mode": pl.Buffered(1)} if single_buffer_weights else {}
        return pl.BlockSpec(shape, lambda n: (0,) * len(shape), **kw)

    grid_spec = pltpu.PrefetchScalarGridSpec(
        num_scalar_prefetch=0,
        grid=(n_chunks,),
        in_specs=[
            pl.BlockSpec((t_chunk * Bp, I), lambda n: (n, 0)),   # streamed x chunk
            w_spec((I, 4 * Hp)),           # W_ih^T  (VMEM-resident)
            w_spec((Hp, 4 * Hp)),          # W_hh^T  (VMEM-resident)
            w_spec((1, 4 * Hp)),           # fused bias (f32)
            w_spec((Hp, Op)),              # W_fc^T  (padded)
            w_spec((1, Op)),               # b_fc    (padded)
        ],
        out_specs=pl.BlockSpec((Bp, Op), lambda n: (0, 0)),      # resident, written once
        scratch_shapes=[
            pltpu.VMEM((t_chunk * Bp, 4 * Hp), jnp.float32),  # xproj for this chunk
            pltpu.VMEM((Bp, Hp), jnp.float32),                # h (persists across chunks)
            pltpu.VMEM((Bp, Hp), jnp.float32),                # c
        ],
    )

    # VMEM request derived from the actual footprint (weights/x/out are
    # double-buffered by the pipeline unless single-buffered), clamped to ~3/4 of
    # the chip's physical VMEM when queryable (v5e/v6e: 128 MiB, v7x: 64 MiB).
    w_bytes = (I * 4 * Hp + Hp * 4 * Hp + Hp * Op) * mm.itemsize + (4 * Hp + Op) * 4
    x_chunk_bytes = t_chunk * Bp * I * mm.itemsize
    scratch_bytes = (t_chunk * Bp * 4 * Hp + 2 * Bp * Hp) * 4
    out_bytes = Bp * Op * 4
    footprint = 2 * (w_bytes + x_chunk_bytes + out_bytes) + scratch_bytes
    vmem_limit = int(max(32 << 20, min(96 << 20, 2 * footprint)))
    try:
        vmem_limit = int(min(vmem_limit,
                             pltpu.get_tpu_info().vmem_capacity_bytes * 3 // 4))
    except Exception:
        pass

    out_padded = pl.pallas_call(
        _lstm_kernel,
        out_shape=jax.ShapeDtypeStruct((Bp, Op), jnp.float32),
        grid_spec=grid_spec,
        compiler_params=pltpu.CompilerParams(
            dimension_semantics=("arbitrary",),          # time is sequential
            vmem_limit_bytes=vmem_limit,
        ),
    )(x_flat, wih_t, whh_t, b, wfc_t, bfc)

    return out_padded[:B, :O]


def reference_forward(x, params):
    """Pure-JAX reference reproducing PyTorch nn.LSTM semantics (eval mode)."""
    w_ih, w_hh, b_ih, b_hh, w_fc, b_fc = params
    B, T, I = x.shape
    H = w_hh.shape[1]
    h = jnp.zeros((B, H), jnp.float32)
    c = jnp.zeros((B, H), jnp.float32)
    for t in range(T):
        gates = x[:, t, :] @ w_ih.T + h @ w_hh.T + b_ih + b_hh
        i_g = jax.nn.sigmoid(gates[:, 0 * H:1 * H])
        f_g = jax.nn.sigmoid(gates[:, 1 * H:2 * H])
        g_g = jnp.tanh(gates[:, 2 * H:3 * H])
        o_g = jax.nn.sigmoid(gates[:, 3 * H:4 * H])
        c = f_g * c + i_g * g_g
        h = o_g * jnp.tanh(c)
    return jax.nn.sigmoid(h @ w_fc.T + b_fc)


def init_params(key, input_size, hidden_size, output_size):
    """Deterministic init matching PyTorch shapes; uniform(-1/sqrt(H), 1/sqrt(H))."""
    ks = jax.random.split(key, 6)
    bound = 1.0 / jnp.sqrt(hidden_size)
    w_ih = jax.random.uniform(ks[0], (4 * hidden_size, input_size),
                              jnp.float32, -bound, bound)
    w_hh = jax.random.uniform(ks[1], (4 * hidden_size, hidden_size),
                              jnp.float32, -bound, bound)
    b_ih = jax.random.uniform(ks[2], (4 * hidden_size,), jnp.float32, -bound, bound)
    b_hh = jax.random.uniform(ks[3], (4 * hidden_size,), jnp.float32, -bound, bound)
    w_fc = jax.random.uniform(ks[4], (output_size, hidden_size),
                              jnp.float32, -bound, bound)
    b_fc = jax.random.uniform(ks[5], (output_size,), jnp.float32, -bound, bound)
    return (w_ih, w_hh, b_ih, b_hh, w_fc, b_fc)


if __name__ == "__main__":
    # NOTE: at this toy size (B=2, H=32) the kernel is latency/overhead-bound; the
    # structure targets realistic H (multiples of 128) and long T.
    B, T, I, H, O = 2, 8, 4, 32, 1

    key = jax.random.PRNGKey(0)
    kx, kp = jax.random.split(key)
    x = jax.random.normal(kx, (B, T, I), jnp.float32)
    params = init_params(kp, I, H, O)

    out = jax.jit(lstm_model_forward)(x, params)
    out = jax.block_until_ready(out)

    ref = reference_forward(x, params)
    assert out.shape == (B, O), out.shape
    assert jnp.allclose(out, ref, atol=2e-5, rtol=2e-5), (out, ref)

    print("KERNEL_OK")
</pallas_src>

<mosaic_0001>
module attributes {stable_mosaic.version = 11 : i64} {
  func.func @_lstm_kernel(%arg0: i32, %arg1: memref<64x4xf32, #tpu.memory_space<vmem>>, %arg2: memref<4x512xf32, #tpu.memory_space<vmem>>, %arg3: memref<128x512xf32, #tpu.memory_space<vmem>>, %arg4: memref<1x512xf32, #tpu.memory_space<vmem>>, %arg5: memref<128x128xf32, #tpu.memory_space<vmem>>, %arg6: memref<1x128xf32, #tpu.memory_space<vmem>>, %arg7: memref<8x128xf32, #tpu.memory_space<vmem>>, %arg8: memref<64x512xf32, #tpu.memory_space<vmem>>, %arg9: memref<8x128xf32, #tpu.memory_space<vmem>>, %arg10: memref<8x128xf32, #tpu.memory_space<vmem>>) attributes {dimension_semantics = [#tpu.dimension_semantics<arbitrary>], iteration_bounds = array<i64: 1>, scalar_prefetch = 0 : i64, scratch_operands = 3 : i64, tpu.core_type = #tpu.core_type<tc>, window_params = [{transform_indices = @transform_0, window_bounds = array<i64: 64, 4>}, {pipeline_mode = #tpu.pipeline_mode<synchronous>, transform_indices = @transform_1, window_bounds = array<i64: 4, 512>}, {pipeline_mode = #tpu.pipeline_mode<synchronous>, transform_indices = @transform_2, window_bounds = array<i64: 128, 512>}, {pipeline_mode = #tpu.pipeline_mode<synchronous>, transform_indices = @transform_3, window_bounds = array<i64: 1, 512>}, {pipeline_mode = #tpu.pipeline_mode<synchronous>, transform_indices = @transform_4, window_bounds = array<i64: 128, 128>}, {pipeline_mode = #tpu.pipeline_mode<synchronous>, transform_indices = @transform_5, window_bounds = array<i64: 1, 128>}, {pipeline_mode = #tpu.pipeline_mode<synchronous>, transform_indices = @transform_6, window_bounds = array<i64: 8, 128>}]} {
    %c0_i32 = arith.constant 0 : i32
    %0 = arith.cmpi eq, %arg0, %c0_i32 : i32
    %1 = arith.extui %0 : i1 to i32
    %c0_i32_0 = arith.constant 0 : i32
    %2 = arith.cmpi ne, %1, %c0_i32_0 : i32
    scf.if %2 {
      %cst_152 = arith.constant 0.000000e+00 : f32
      %345 = vector.broadcast %cst_152 : f32 to vector<8x128xf32>
      %c0_153 = arith.constant 0 : index
      %c0_154 = arith.constant 0 : index
      %346 = vector.load %arg9[%c0_153, %c0_154] : memref<8x128xf32, #tpu.memory_space<vmem>>, vector<8x128xf32>
      tpu.vector_store %arg9[%c0_153, %c0_154], %345 {strides = array<i32>} : memref<8x128xf32, #tpu.memory_space<vmem>>, vector<8x128xf32>,
      %cst_155 = arith.constant 0.000000e+00 : f32
      %347 = vector.broadcast %cst_155 : f32 to vector<8x128xf32>
      %c0_156 = arith.constant 0 : index
      %c0_157 = arith.constant 0 : index
      %348 = vector.load %arg10[%c0_156, %c0_157] : memref<8x128xf32, #tpu.memory_space<vmem>>, vector<8x128xf32>
      tpu.vector_store %arg10[%c0_156, %c0_157], %347 {strides = array<i32>} : memref<8x128xf32, #tpu.memory_space<vmem>>, vector<8x128xf32>,
    } else {
    }
    %c0 = arith.constant 0 : index
    %c0_1 = arith.constant 0 : index
    %3 = vector.load %arg1[%c0, %c0_1] : memref<64x4xf32, #tpu.memory_space<vmem>>, vector<64x4xf32>
    %c0_2 = arith.constant 0 : index
    %c0_3 = arith.constant 0 : index
    %4 = vector.load %arg2[%c0_2, %c0_3] : memref<4x512xf32, #tpu.memory_space<vmem>>, vector<4x512xf32>
    %cst = arith.constant dense<0.000000e+00> : vector<64x512xf32>
    %5 = tpu.matmul %3, %4, %cst {dimension_numbers = #tpu.dot_dimension_numbers<[1], [0], [0], [1], [0, 0, 1, 1], [], []>} : vector<64x4xf32>, vector<4x512xf32>, vector<64x512xf32> -> vector<64x512xf32>
    %c0_4 = arith.constant 0 : index
    %c0_5 = arith.constant 0 : index
    %6 = vector.load %arg4[%c0_4, %c0_5] : memref<1x512xf32, #tpu.memory_space<vmem>>, vector<1x512xf32>
    %7 = vector.broadcast %6 : vector<1x512xf32> to vector<64x512xf32>
    %8 = arith.addf %5, %7 : vector<64x512xf32>
    %c0_6 = arith.constant 0 : index
    %c0_7 = arith.constant 0 : index
    %9 = vector.load %arg8[%c0_6, %c0_7] : memref<64x512xf32, #tpu.memory_space<vmem>>, vector<64x512xf32>
    tpu.vector_store %arg8[%c0_6, %c0_7], %8 {strides = array<i32>} : memref<64x512xf32, #tpu.memory_space<vmem>>, vector<64x512xf32>,
    %c0_8 = arith.constant 0 : index
    %c0_9 = arith.constant 0 : index
    %10 = vector.load %arg9[%c0_8, %c0_9] : memref<8x128xf32, #tpu.memory_space<vmem>>, vector<8x128xf32>
    %c0_10 = arith.constant 0 : index
    %c0_11 = arith.constant 0 : index
    %11 = vector.load %arg10[%c0_10, %c0_11] : memref<8x128xf32, #tpu.memory_space<vmem>>, vector<8x128xf32>
    %c0_i32_12 = arith.constant 0 : i32
    %c8_i32 = arith.constant 8 : i32
    %12 = arith.muli %c0_i32_12, %c8_i32 : i32
    %13 = tpu.assume_multiple %12, 8 : i32
    %14 = arith.index_cast %13 : i32 to index
    %c0_13 = arith.constant 0 : index
    %15 = vector.load %arg8[%14, %c0_13] : memref<64x512xf32, #tpu.memory_space<vmem>>, vector<8x512xf32>
    %16 = vector.extract_strided_slice %15 {offsets = [0, 0], sizes = [8, 128], strides = [1, 1]} : vector<8x512xf32> to vector<8x128xf32>
    %c0_14 = arith.constant 0 : index
    %c0_15 = arith.constant 0 : index
    %17 = vector.load %arg3[%c0_14, %c0_15] : memref<128x512xf32, #tpu.memory_space<vmem>>, vector<128x128xf32>
    %cst_16 = arith.constant dense<0.000000e+00> : vector<8x128xf32>
    %18 = tpu.matmul %10, %17, %cst_16 {dimension_numbers = #tpu.dot_dimension_numbers<[1], [0], [0], [1], [0, 0, 1, 1], [], []>} : vector<8x128xf32>, vector<128x128xf32>, vector<8x128xf32> -> vector<8x128xf32>
    %19 = arith.addf %16, %18 : vector<8x128xf32>
    %20 = arith.negf %19 : vector<8x128xf32>
    %21 = math.exp %20 : vector<8x128xf32>
    %cst_17 = arith.constant 1.000000e+00 : f32
    %22 = vector.broadcast %cst_17 : f32 to vector<8x128xf32>
    %23 = arith.addf %22, %21 : vector<8x128xf32>
    %24 = arith.divf %22, %23 : vector<8x128xf32>
    %25 = vector.extract_strided_slice %15 {offsets = [0, 128], sizes = [8, 128], strides = [1, 1]} : vector<8x512xf32> to vector<8x128xf32>
    %c0_18 = arith.constant 0 : index
    %c128 = arith.constant 128 : index
    %26 = vector.load %arg3[%c0_18, %c128] : memref<128x512xf32, #tpu.memory_space<vmem>>, vector<128x128xf32>
    %cst_19 = arith.constant dense<0.000000e+00> : vector<8x128xf32>
    %27 = tpu.matmul %10, %26, %cst_19 {dimension_numbers = #tpu.dot_dimension_numbers<[1], [0], [0], [1], [0, 0, 1, 1], [], []>} : vector<8x128xf32>, vector<128x128xf32>, vector<8x128xf32> -> vector<8x128xf32>
    %28 = arith.addf %25, %27 : vector<8x128xf32>
    %29 = arith.negf %28 : vector<8x128xf32>
    %30 = math.exp %29 : vector<8x128xf32>
    %cst_20 = arith.constant 1.000000e+00 : f32
    %31 = vector.broadcast %cst_20 : f32 to vector<8x128xf32>
    %32 = arith.addf %31, %30 : vector<8x128xf32>
    %33 = arith.divf %31, %32 : vector<8x128xf32>
    %34 = vector.extract_strided_slice %15 {offsets = [0, 256], sizes = [8, 128], strides = [1, 1]} : vector<8x512xf32> to vector<8x128xf32>
    %c0_21 = arith.constant 0 : index
    %c256 = arith.constant 256 : index
    %35 = vector.load %arg3[%c0_21, %c256] : memref<128x512xf32, #tpu.memory_space<vmem>>, vector<128x128xf32>
    %cst_22 = arith.constant dense<0.000000e+00> : vector<8x128xf32>
    %36 = tpu.matmul %10, %35, %cst_22 {dimension_numbers = #tpu.dot_dimension_numbers<[1], [0], [0], [1], [0, 0, 1, 1], [], []>} : vector<8x128xf32>, vector<128x128xf32>, vector<8x128xf32> -> vector<8x128xf32>
    %37 = arith.addf %34, %36 : vector<8x128xf32>
    %38 = math.tanh %37 : vector<8x128xf32>
    %39 = vector.extract_strided_slice %15 {offsets = [0, 384], sizes = [8, 128], strides = [1, 1]} : vector<8x512xf32> to vector<8x128xf32>
    %c0_23 = arith.constant 0 : index
    %c384 = arith.constant 384 : index
    %40 = vector.load %arg3[%c0_23, %c384] : memref<128x512xf32, #tpu.memory_space<vmem>>, vector<128x128xf32>
    %cst_24 = arith.constant dense<0.000000e+00> : vector<8x128xf32>
    %41 = tpu.matmul %10, %40, %cst_24 {dimension_numbers = #tpu.dot_dimension_numbers<[1], [0], [0], [1], [0, 0, 1, 1], [], []>} : vector<8x128xf32>, vector<128x128xf32>, vector<8x128xf32> -> vector<8x128xf32>
    %42 = arith.addf %39, %41 : vector<8x128xf32>
    %43 = arith.negf %42 : vector<8x128xf32>
    %44 = math.exp %43 : vector<8x128xf32>
    %cst_25 = arith.constant 1.000000e+00 : f32
    %45 = vector.broadcast %cst_25 : f32 to vector<8x128xf32>
    %46 = arith.addf %45, %44 : vector<8x128xf32>
    %47 = arith.divf %45, %46 : vector<8x128xf32>
    %48 = arith.mulf %33, %11 : vector<8x128xf32>
    %49 = arith.mulf %24, %38 : vector<8x128xf32>
    %50 = arith.addf %48, %49 : vector<8x128xf32>
    %51 = math.tanh %50 : vector<8x128xf32>
    %52 = arith.mulf %47, %51 : vector<8x128xf32>
    %c1_i32 = arith.constant 1 : i32
    %c8_i32_26 = arith.constant 8 : i32
    %53 = arith.muli %c1_i32, %c8_i32_26 : i32
    %54 = tpu.assume_multiple %53, 8 : i32
    %55 = arith.index_cast %54 : i32 to index
    %c0_27 = arith.constant 0 : index
    %56 = vector.load %arg8[%55, %c0_27] : memref<64x512xf32, #tpu.memory_space<vmem>>, vector<8x512xf32>
    %57 = vector.extract_strided_slice %56 {offsets = [0, 0], sizes = [8, 128], strides = [1, 1]} : vector<8x512xf32> to vector<8x128xf32>
    %c0_28 = arith.constant 0 : index
    %c0_29 = arith.constant 0 : index
    %58 = vector.load %arg3[%c0_28, %c0_29] : memref<128x512xf32, #tpu.memory_space<vmem>>, vector<128x128xf32>
    %cst_30 = arith.constant dense<0.000000e+00> : vector<8x128xf32>
    %59 = tpu.matmul %52, %58, %cst_30 {dimension_numbers = #tpu.dot_dimension_numbers<[1], [0], [0], [1], [0, 0, 1, 1], [], []>} : vector<8x128xf32>, vector<128x128xf32>, vector<8x128xf32> -> vector<8x128xf32>
    %60 = arith.addf %57, %59 : vector<8x128xf32>
    %61 = arith.negf %60 : vector<8x128xf32>
    %62 = math.exp %61 : vector<8x128xf32>
    %cst_31 = arith.constant 1.000000e+00 : f32
    %63 = vector.broadcast %cst_31 : f32 to vector<8x128xf32>
    %64 = arith.addf %63, %62 : vector<8x128xf32>
    %65 = arith.divf %63, %64 : vector<8x128xf32>
    %66 = vector.extract_strided_slice %56 {offsets = [0, 128], sizes = [8, 128], strides = [1, 1]} : vector<8x512xf32> to vector<8x128xf32>
    %c0_32 = arith.constant 0 : index
    %c128_33 = arith.constant 128 : index
    %67 = vector.load %arg3[%c0_32, %c128_33] : memref<128x512xf32, #tpu.memory_space<vmem>>, vector<128x128xf32>
    %cst_34 = arith.constant dense<0.000000e+00> : vector<8x128xf32>
    %68 = tpu.matmul %52, %67, %cst_34 {dimension_numbers = #tpu.dot_dimension_numbers<[1], [0], [0], [1], [0, 0, 1, 1], [], []>} : vector<8x128xf32>, vector<128x128xf32>, vector<8x128xf32> -> vector<8x128xf32>
    %69 = arith.addf %66, %68 : vector<8x128xf32>
    %70 = arith.negf %69 : vector<8x128xf32>
    %71 = math.exp %70 : vector<8x128xf32>
    %cst_35 = arith.constant 1.000000e+00 : f32
    %72 = vector.broadcast %cst_35 : f32 to vector<8x128xf32>
    %73 = arith.addf %72, %71 : vector<8x128xf32>
    %74 = arith.divf %72, %73 : vector<8x128xf32>
    %75 = vector.extract_strided_slice %56 {offsets = [0, 256], sizes = [8, 128], strides = [1, 1]} : vector<8x512xf32> to vector<8x128xf32>
    %c0_36 = arith.constant 0 : index
    %c256_37 = arith.constant 256 : index
    %76 = vector.load %arg3[%c0_36, %c256_37] : memref<128x512xf32, #tpu.memory_space<vmem>>, vector<128x128xf32>
    %cst_38 = arith.constant dense<0.000000e+00> : vector<8x128xf32>
    %77 = tpu.matmul %52, %76, %cst_38 {dimension_numbers = #tpu.dot_dimension_numbers<[1], [0], [0], [1], [0, 0, 1, 1], [], []>} : vector<8x128xf32>, vector<128x128xf32>, vector<8x128xf32> -> vector<8x128xf32>
    %78 = arith.addf %75, %77 : vector<8x128xf32>
    %79 = math.tanh %78 : vector<8x128xf32>
    %80 = vector.extract_strided_slice %56 {offsets = [0, 384], sizes = [8, 128], strides = [1, 1]} : vector<8x512xf32> to vector<8x128xf32>
    %c0_39 = arith.constant 0 : index
    %c384_40 = arith.constant 384 : index
    %81 = vector.load %arg3[%c0_39, %c384_40] : memref<128x512xf32, #tpu.memory_space<vmem>>, vector<128x128xf32>
    %cst_41 = arith.constant dense<0.000000e+00> : vector<8x128xf32>
    %82 = tpu.matmul %52, %81, %cst_41 {dimension_numbers = #tpu.dot_dimension_numbers<[1], [0], [0], [1], [0, 0, 1, 1], [], []>} : vector<8x128xf32>, vector<128x128xf32>, vector<8x128xf32> -> vector<8x128xf32>
    %83 = arith.addf %80, %82 : vector<8x128xf32>
    %84 = arith.negf %83 : vector<8x128xf32>
    %85 = math.exp %84 : vector<8x128xf32>
    %cst_42 = arith.constant 1.000000e+00 : f32
    %86 = vector.broadcast %cst_42 : f32 to vector<8x128xf32>
    %87 = arith.addf %86, %85 : vector<8x128xf32>
    %88 = arith.divf %86, %87 : vector<8x128xf32>
    %89 = arith.mulf %74, %50 : vector<8x128xf32>
    %90 = arith.mulf %65, %79 : vector<8x128xf32>
    %91 = arith.addf %89, %90 : vector<8x128xf32>
    %92 = math.tanh %91 : vector<8x128xf32>
    %93 = arith.mulf %88, %92 : vector<8x128xf32>
    %c2_i32 = arith.constant 2 : i32
    %c8_i32_43 = arith.constant 8 : i32
    %94 = arith.muli %c2_i32, %c8_i32_43 : i32
    %95 = tpu.assume_multiple %94, 8 : i32
    %96 = arith.index_cast %95 : i32 to index
    %c0_44 = arith.constant 0 : index
    %97 = vector.load %arg8[%96, %c0_44] : memref<64x512xf32, #tpu.memory_space<vmem>>, vector<8x512xf32>
    %98 = vector.extract_strided_slice %97 {offsets = [0, 0], sizes = [8, 128], strides = [1, 1]} : vector<8x512xf32> to vector<8x128xf32>
    %c0_45 = arith.constant 0 : index
    %c0_46 = arith.constant 0 : index
    %99 = vector.load %arg3[%c0_45, %c0_46] : memref<128x512xf32, #tpu.memory_space<vmem>>, vector<128x128xf32>
    %cst_47 = arith.constant dense<0.000000e+00> : vector<8x128xf32>
    %100 = tpu.matmul %93, %99, %cst_47 {dimension_numbers = #tpu.dot_dimension_numbers<[1], [0], [0], [1], [0, 0, 1, 1], [], []>} : vector<8x128xf32>, vector<128x128xf32>, vector<8x128xf32> -> vector<8x128xf32>
    %101 = arith.addf %98, %100 : vector<8x128xf32>
    %102 = arith.negf %101 : vector<8x128xf32>
    %103 = math.exp %102 : vector<8x128xf32>
    %cst_48 = arith.constant 1.000000e+00 : f32
    %104 = vector.broadcast %cst_48 : f32 to vector<8x128xf32>
    %105 = arith.addf %104, %103 : vector<8x128xf32>
    %106 = arith.divf %104, %105 : vector<8x128xf32>
    %107 = vector.extract_strided_slice %97 {offsets = [0, 128], sizes = [8, 128], strides = [1, 1]} : vector<8x512xf32> to vector<8x128xf32>
    %c0_49 = arith.constant 0 : index
    %c128_50 = arith.constant 128 : index
    %108 = vector.load %arg3[%c0_49, %c128_50] : memref<128x512xf32, #tpu.memory_space<vmem>>, vector<128x128xf32>
    %cst_51 = arith.constant dense<0.000000e+00> : vector<8x128xf32>
    %109 = tpu.matmul %93, %108, %cst_51 {dimension_numbers = #tpu.dot_dimension_numbers<[1], [0], [0], [1], [0, 0, 1, 1], [], []>} : vector<8x128xf32>, vector<128x128xf32>, vector<8x128xf32> -> vector<8x128xf32>
    %110 = arith.addf %107, %109 : vector<8x128xf32>
    %111 = arith.negf %110 : vector<8x128xf32>
    %112 = math.exp %111 : vector<8x128xf32>
    %cst_52 = arith.constant 1.000000e+00 : f32
    %113 = vector.broadcast %cst_52 : f32 to vector<8x128xf32>
    %114 = arith.addf %113, %112 : vector<8x128xf32>
    %115 = arith.divf %113, %114 : vector<8x128xf32>
    %116 = vector.extract_strided_slice %97 {offsets = [0, 256], sizes = [8, 128], strides = [1, 1]} : vector<8x512xf32> to vector<8x128xf32>
    %c0_53 = arith.constant 0 : index
    %c256_54 = arith.constant 256 : index
    %117 = vector.load %arg3[%c0_53, %c256_54] : memref<128x512xf32, #tpu.memory_space<vmem>>, vector<128x128xf32>
    %cst_55 = arith.constant dense<0.000000e+00> : vector<8x128xf32>
    %118 = tpu.matmul %93, %117, %cst_55 {dimension_numbers = #tpu.dot_dimension_numbers<[1], [0], [0], [1], [0, 0, 1, 1], [], []>} : vector<8x128xf32>, vector<128x128xf32>, vector<8x128xf32> -> vector<8x128xf32>
    %119 = arith.addf %116, %118 : vector<8x128xf32>
    %120 = math.tanh %119 : vector<8x128xf32>
    %121 = vector.extract_strided_slice %97 {offsets = [0, 384], sizes = [8, 128], strides = [1, 1]} : vector<8x512xf32> to vector<8x128xf32>
    %c0_56 = arith.constant 0 : index
    %c384_57 = arith.constant 384 : index
    %122 = vector.load %arg3[%c0_56, %c384_57] : memref<128x512xf32, #tpu.memory_space<vmem>>, vector<128x128xf32>
    %cst_58 = arith.constant dense<0.000000e+00> : vector<8x128xf32>
    %123 = tpu.matmul %93, %122, %cst_58 {dimension_numbers = #tpu.dot_dimension_numbers<[1], [0], [0], [1], [0, 0, 1, 1], [], []>} : vector<8x128xf32>, vector<128x128xf32>, vector<8x128xf32> -> vector<8x128xf32>
    %124 = arith.addf %121, %123 : vector<8x128xf32>
    %125 = arith.negf %124 : vector<8x128xf32>
    %126 = math.exp %125 : vector<8x128xf32>
    %cst_59 = arith.constant 1.000000e+00 : f32
    %127 = vector.broadcast %cst_59 : f32 to vector<8x128xf32>
    %128 = arith.addf %127, %126 : vector<8x128xf32>
    %129 = arith.divf %127, %128 : vector<8x128xf32>
    %130 = arith.mulf %115, %91 : vector<8x128xf32>
    %131 = arith.mulf %106, %120 : vector<8x128xf32>
    %132 = arith.addf %130, %131 : vector<8x128xf32>
    %133 = math.tanh %132 : vector<8x128xf32>
    %134 = arith.mulf %129, %133 : vector<8x128xf32>
    %c3_i32 = arith.constant 3 : i32
    %c8_i32_60 = arith.constant 8 : i32
    %135 = arith.muli %c3_i32, %c8_i32_60 : i32
    %136 = tpu.assume_multiple %135, 8 : i32
    %137 = arith.index_cast %136 : i32 to index
    %c0_61 = arith.constant 0 : index
    %138 = vector.load %arg8[%137, %c0_61] : memref<64x512xf32, #tpu.memory_space<vmem>>, vector<8x512xf32>
    %139 = vector.extract_strided_slice %138 {offsets = [0, 0], sizes = [8, 128], strides = [1, 1]} : vector<8x512xf32> to vector<8x128xf32>
    %c0_62 = arith.constant 0 : index
    %c0_63 = arith.constant 0 : index
    %140 = vector.load %arg3[%c0_62, %c0_63] : memref<128x512xf32, #tpu.memory_space<vmem>>, vector<128x128xf32>
    %cst_64 = arith.constant dense<0.000000e+00> : vector<8x128xf32>
    %141 = tpu.matmul %134, %140, %cst_64 {dimension_numbers = #tpu.dot_dimension_numbers<[1], [0], [0], [1], [0, 0, 1, 1], [], []>} : vector<8x128xf32>, vector<128x128xf32>, vector<8x128xf32> -> vector<8x128xf32>
    %142 = arith.addf %139, %141 : vector<8x128xf32>
    %143 = arith.negf %142 : vector<8x128xf32>
    %144 = math.exp %143 : vector<8x128xf32>
    %cst_65 = arith.constant 1.000000e+00 : f32
    %145 = vector.broadcast %cst_65 : f32 to vector<8x128xf32>
    %146 = arith.addf %145, %144 : vector<8x128xf32>
    %147 = arith.divf %145, %146 : vector<8x128xf32>
    %148 = vector.extract_strided_slice %138 {offsets = [0, 128], sizes = [8, 128], strides = [1, 1]} : vector<8x512xf32> to vector<8x128xf32>
    %c0_66 = arith.constant 0 : index
    %c128_67 = arith.constant 128 : index
    %149 = vector.load %arg3[%c0_66, %c128_67] : memref<128x512xf32, #tpu.memory_space<vmem>>, vector<128x128xf32>
    %cst_68 = arith.constant dense<0.000000e+00> : vector<8x128xf32>
    %150 = tpu.matmul %134, %149, %cst_68 {dimension_numbers = #tpu.dot_dimension_numbers<[1], [0], [0], [1], [0, 0, 1, 1], [], []>} : vector<8x128xf32>, vector<128x128xf32>, vector<8x128xf32> -> vector<8x128xf32>
    %151 = arith.addf %148, %150 : vector<8x128xf32>
    %152 = arith.negf %151 : vector<8x128xf32>
    %153 = math.exp %152 : vector<8x128xf32>
    %cst_69 = arith.constant 1.000000e+00 : f32
    %154 = vector.broadcast %cst_69 : f32 to vector<8x128xf32>
    %155 = arith.addf %154, %153 : vector<8x128xf32>
    %156 = arith.divf %154, %155 : vector<8x128xf32>
    %157 = vector.extract_strided_slice %138 {offsets = [0, 256], sizes = [8, 128], strides = [1, 1]} : vector<8x512xf32> to vector<8x128xf32>
    %c0_70 = arith.constant 0 : index
    %c256_71 = arith.constant 256 : index
    %158 = vector.load %arg3[%c0_70, %c256_71] : memref<128x512xf32, #tpu.memory_space<vmem>>, vector<128x128xf32>
    %cst_72 = arith.constant dense<0.000000e+00> : vector<8x128xf32>
    %159 = tpu.matmul %134, %158, %cst_72 {dimension_numbers = #tpu.dot_dimension_numbers<[1], [0], [0], [1], [0, 0, 1, 1], [], []>} : vector<8x128xf32>, vector<128x128xf32>, vector<8x128xf32> -> vector<8x128xf32>
    %160 = arith.addf %157, %159 : vector<8x128xf32>
    %161 = math.tanh %160 : vector<8x128xf32>
    %162 = vector.extract_strided_slice %138 {offsets = [0, 384], sizes = [8, 128], strides = [1, 1]} : vector<8x512xf32> to vector<8x128xf32>
    %c0_73 = arith.constant 0 : index
    %c384_74 = arith.constant 384 : index
    %163 = vector.load %arg3[%c0_73, %c384_74] : memref<128x512xf32, #tpu.memory_space<vmem>>, vector<128x128xf32>
    %cst_75 = arith.constant dense<0.000000e+00> : vector<8x128xf32>
    %164 = tpu.matmul %134, %163, %cst_75 {dimension_numbers = #tpu.dot_dimension_numbers<[1], [0], [0], [1], [0, 0, 1, 1], [], []>} : vector<8x128xf32>, vector<128x128xf32>, vector<8x128xf32> -> vector<8x128xf32>
    %165 = arith.addf %162, %164 : vector<8x128xf32>
    %166 = arith.negf %165 : vector<8x128xf32>
    %167 = math.exp %166 : vector<8x128xf32>
    %cst_76 = arith.constant 1.000000e+00 : f32
    %168 = vector.broadcast %cst_76 : f32 to vector<8x128xf32>
    %169 = arith.addf %168, %167 : vector<8x128xf32>
    %170 = arith.divf %168, %169 : vector<8x128xf32>
    %171 = arith.mulf %156, %132 : vector<8x128xf32>
    %172 = arith.mulf %147, %161 : vector<8x128xf32>
    %173 = arith.addf %171, %172 : vector<8x128xf32>
    %174 = math.tanh %173 : vector<8x128xf32>
    %175 = arith.mulf %170, %174 : vector<8x128xf32>
    %c4_i32 = arith.constant 4 : i32
    %c8_i32_77 = arith.constant 8 : i32
    %176 = arith.muli %c4_i32, %c8_i32_77 : i32
    %177 = tpu.assume_multiple %176, 8 : i32
    %178 = arith.index_cast %177 : i32 to index
    %c0_78 = arith.constant 0 : index
    %179 = vector.load %arg8[%178, %c0_78] : memref<64x512xf32, #tpu.memory_space<vmem>>, vector<8x512xf32>
    %180 = vector.extract_strided_slice %179 {offsets = [0, 0], sizes = [8, 128], strides = [1, 1]} : vector<8x512xf32> to vector<8x128xf32>
    %c0_79 = arith.constant 0 : index
    %c0_80 = arith.constant 0 : index
    %181 = vector.load %arg3[%c0_79, %c0_80] : memref<128x512xf32, #tpu.memory_space<vmem>>, vector<128x128xf32>
    %cst_81 = arith.constant dense<0.000000e+00> : vector<8x128xf32>
    %182 = tpu.matmul %175, %181, %cst_81 {dimension_numbers = #tpu.dot_dimension_numbers<[1], [0], [0], [1], [0, 0, 1, 1], [], []>} : vector<8x128xf32>, vector<128x128xf32>, vector<8x128xf32> -> vector<8x128xf32>
    %183 = arith.addf %180, %182 : vector<8x128xf32>
    %184 = arith.negf %183 : vector<8x128xf32>
    %185 = math.exp %184 : vector<8x128xf32>
    %cst_82 = arith.constant 1.000000e+00 : f32
    %186 = vector.broadcast %cst_82 : f32 to vector<8x128xf32>
    %187 = arith.addf %186, %185 : vector<8x128xf32>
    %188 = arith.divf %186, %187 : vector<8x128xf32>
    %189 = vector.extract_strided_slice %179 {offsets = [0, 128], sizes = [8, 128], strides = [1, 1]} : vector<8x512xf32> to vector<8x128xf32>
    %c0_83 = arith.constant 0 : index
    %c128_84 = arith.constant 128 : index
    %190 = vector.load %arg3[%c0_83, %c128_84] : memref<128x512xf32, #tpu.memory_space<vmem>>, vector<128x128xf32>
    %cst_85 = arith.constant dense<0.000000e+00> : vector<8x128xf32>
    %191 = tpu.matmul %175, %190, %cst_85 {dimension_numbers = #tpu.dot_dimension_numbers<[1], [0], [0], [1], [0, 0, 1, 1], [], []>} : vector<8x128xf32>, vector<128x128xf32>, vector<8x128xf32> -> vector<8x128xf32>
    %192 = arith.addf %189, %191 : vector<8x128xf32>
    %193 = arith.negf %192 : vector<8x128xf32>
    %194 = math.exp %193 : vector<8x128xf32>
    %cst_86 = arith.constant 1.000000e+00 : f32
    %195 = vector.broadcast %cst_86 : f32 to vector<8x128xf32>
    %196 = arith.addf %195, %194 : vector<8x128xf32>
    %197 = arith.divf %195, %196 : vector<8x128xf32>
    %198 = vector.extract_strided_slice %179 {offsets = [0, 256], sizes = [8, 128], strides = [1, 1]} : vector<8x512xf32> to vector<8x128xf32>
    %c0_87 = arith.constant 0 : index
    %c256_88 = arith.constant 256 : index
    %199 = vector.load %arg3[%c0_87, %c256_88] : memref<128x512xf32, #tpu.memory_space<vmem>>, vector<128x128xf32>
    %cst_89 = arith.constant dense<0.000000e+00> : vector<8x128xf32>
    %200 = tpu.matmul %175, %199, %cst_89 {dimension_numbers = #tpu.dot_dimension_numbers<[1], [0], [0], [1], [0, 0, 1, 1], [], []>} : vector<8x128xf32>, vector<128x128xf32>, vector<8x128xf32> -> vector<8x128xf32>
    %201 = arith.addf %198, %200 : vector<8x128xf32>
    %202 = math.tanh %201 : vector<8x128xf32>
    %203 = vector.extract_strided_slice %179 {offsets = [0, 384], sizes = [8, 128], strides = [1, 1]} : vector<8x512xf32> to vector<8x128xf32>
    %c0_90 = arith.constant 0 : index
    %c384_91 = arith.constant 384 : index
    %204 = vector.load %arg3[%c0_90, %c384_91] : memref<128x512xf32, #tpu.memory_space<vmem>>, vector<128x128xf32>
    %cst_92 = arith.constant dense<0.000000e+00> : vector<8x128xf32>
    %205 = tpu.matmul %175, %204, %cst_92 {dimension_numbers = #tpu.dot_dimension_numbers<[1], [0], [0], [1], [0, 0, 1, 1], [], []>} : vector<8x128xf32>, vector<128x128xf32>, vector<8x128xf32> -> vector<8x128xf32>
    %206 = arith.addf %203, %205 : vector<8x128xf32>
    %207 = arith.negf %206 : vector<8x128xf32>
    %208 = math.exp %207 : vector<8x128xf32>
    %cst_93 = arith.constant 1.000000e+00 : f32
    %209 = vector.broadcast %cst_93 : f32 to vector<8x128xf32>
    %210 = arith.addf %209, %208 : vector<8x128xf32>
    %211 = arith.divf %209, %210 : vector<8x128xf32>
    %212 = arith.mulf %197, %173 : vector<8x128xf32>
    %213 = arith.mulf %188, %202 : vector<8x128xf32>
    %214 = arith.addf %212, %213 : vector<8x128xf32>
    %215 = math.tanh %214 : vector<8x128xf32>
    %216 = arith.mulf %211, %215 : vector<8x128xf32>
    %c5_i32 = arith.constant 5 : i32
    %c8_i32_94 = arith.constant 8 : i32
    %217 = arith.muli %c5_i32, %c8_i32_94 : i32
    %218 = tpu.assume_multiple %217, 8 : i32
    %219 = arith.index_cast %218 : i32 to index
    %c0_95 = arith.constant 0 : index
    %220 = vector.load %arg8[%219, %c0_95] : memref<64x512xf32, #tpu.memory_space<vmem>>, vector<8x512xf32>
    %221 = vector.extract_strided_slice %220 {offsets = [0, 0], sizes = [8, 128], strides = [1, 1]} : vector<8x512xf32> to vector<8x128xf32>
    %c0_96 = arith.constant 0 : index
    %c0_97 = arith.constant 0 : index
    %222 = vector.load %arg3[%c0_96, %c0_97] : memref<128x512xf32, #tpu.memory_space<vmem>>, vector<128x128xf32>
    %cst_98 = arith.constant dense<0.000000e+00> : vector<8x128xf32>
    %223 = tpu.matmul %216, %222, %cst_98 {dimension_numbers = #tpu.dot_dimension_numbers<[1], [0], [0], [1], [0, 0, 1, 1], [], []>} : vector<8x128xf32>, vector<128x128xf32>, vector<8x128xf32> -> vector<8x128xf32>
    %224 = arith.addf %221, %223 : vector<8x128xf32>
    %225 = arith.negf %224 : vector<8x128xf32>
    %226 = math.exp %225 : vector<8x128xf32>
    %cst_99 = arith.constant 1.000000e+00 : f32
    %227 = vector.broadcast %cst_99 : f32 to vector<8x128xf32>
    %228 = arith.addf %227, %226 : vector<8x128xf32>
    %229 = arith.divf %227, %228 : vector<8x128xf32>
    %230 = vector.extract_strided_slice %220 {offsets = [0, 128], sizes = [8, 128], strides = [1, 1]} : vector<8x512xf32> to vector<8x128xf32>
    %c0_100 = arith.constant 0 : index
    %c128_101 = arith.constant 128 : index
    %231 = vector.load %arg3[%c0_100, %c128_101] : memref<128x512xf32, #tpu.memory_space<vmem>>, vector<128x128xf32>
    %cst_102 = arith.constant dense<0.000000e+00> : vector<8x128xf32>
    %232 = tpu.matmul %216, %231, %cst_102 {dimension_numbers = #tpu.dot_dimension_numbers<[1], [0], [0], [1], [0, 0, 1, 1], [], []>} : vector<8x128xf32>, vector<128x128xf32>, vector<8x128xf32> -> vector<8x128xf32>
    %233 = arith.addf %230, %232 : vector<8x128xf32>
    %234 = arith.negf %233 : vector<8x128xf32>
    %235 = math.exp %234 : vector<8x128xf32>
    %cst_103 = arith.constant 1.000000e+00 : f32
    %236 = vector.broadcast %cst_103 : f32 to vector<8x128xf32>
    %237 = arith.addf %236, %235 : vector<8x128xf32>
    %238 = arith.divf %236, %237 : vector<8x128xf32>
    %239 = vector.extract_strided_slice %220 {offsets = [0, 256], sizes = [8, 128], strides = [1, 1]} : vector<8x512xf32> to vector<8x128xf32>
    %c0_104 = arith.constant 0 : index
    %c256_105 = arith.constant 256 : index
    %240 = vector.load %arg3[%c0_104, %c256_105] : memref<128x512xf32, #tpu.memory_space<vmem>>, vector<128x128xf32>
    %cst_106 = arith.constant dense<0.000000e+00> : vector<8x128xf32>
    %241 = tpu.matmul %216, %240, %cst_106 {dimension_numbers = #tpu.dot_dimension_numbers<[1], [0], [0], [1], [0, 0, 1, 1], [], []>} : vector<8x128xf32>, vector<128x128xf32>, vector<8x128xf32> -> vector<8x128xf32>
    %242 = arith.addf %239, %241 : vector<8x128xf32>
    %243 = math.tanh %242 : vector<8x128xf32>
    %244 = vector.extract_strided_slice %220 {offsets = [0, 384], sizes = [8, 128], strides = [1, 1]} : vector<8x512xf32> to vector<8x128xf32>
    %c0_107 = arith.constant 0 : index
    %c384_108 = arith.constant 384 : index
    %245 = vector.load %arg3[%c0_107, %c384_108] : memref<128x512xf32, #tpu.memory_space<vmem>>, vector<128x128xf32>
    %cst_109 = arith.constant dense<0.000000e+00> : vector<8x128xf32>
    %246 = tpu.matmul %216, %245, %cst_109 {dimension_numbers = #tpu.dot_dimension_numbers<[1], [0], [0], [1], [0, 0, 1, 1], [], []>} : vector<8x128xf32>, vector<128x128xf32>, vector<8x128xf32> -> vector<8x128xf32>
    %247 = arith.addf %244, %246 : vector<8x128xf32>
    %248 = arith.negf %247 : vector<8x128xf32>
    %249 = math.exp %248 : vector<8x128xf32>
    %cst_110 = arith.constant 1.000000e+00 : f32
    %250 = vector.broadcast %cst_110 : f32 to vector<8x128xf32>
    %251 = arith.addf %250, %249 : vector<8x128xf32>
    %252 = arith.divf %250, %251 : vector<8x128xf32>
    %253 = arith.mulf %238, %214 : vector<8x128xf32>
    %254 = arith.mulf %229, %243 : vector<8x128xf32>
    %255 = arith.addf %253, %254 : vector<8x128xf32>
    %256 = math.tanh %255 : vector<8x128xf32>
    %257 = arith.mulf %252, %256 : vector<8x128xf32>
    %c6_i32 = arith.constant 6 : i32
    %c8_i32_111 = arith.constant 8 : i32
    %258 = arith.muli %c6_i32, %c8_i32_111 : i32
    %259 = tpu.assume_multiple %258, 8 : i32
    %260 = arith.index_cast %259 : i32 to index
    %c0_112 = arith.constant 0 : index
    %261 = vector.load %arg8[%260, %c0_112] : memref<64x512xf32, #tpu.memory_space<vmem>>, vector<8x512xf32>
    %262 = vector.extract_strided_slice %261 {offsets = [0, 0], sizes = [8, 128], strides = [1, 1]} : vector<8x512xf32> to vector<8x128xf32>
    %c0_113 = arith.constant 0 : index
    %c0_114 = arith.constant 0 : index
    %263 = vector.load %arg3[%c0_113, %c0_114] : memref<128x512xf32, #tpu.memory_space<vmem>>, vector<128x128xf32>
    %cst_115 = arith.constant dense<0.000000e+00> : vector<8x128xf32>
    %264 = tpu.matmul %257, %263, %cst_115 {dimension_numbers = #tpu.dot_dimension_numbers<[1], [0], [0], [1], [0, 0, 1, 1], [], []>} : vector<8x128xf32>, vector<128x128xf32>, vector<8x128xf32> -> vector<8x128xf32>
    %265 = arith.addf %262, %264 : vector<8x128xf32>
    %266 = arith.negf %265 : vector<8x128xf32>
    %267 = math.exp %266 : vector<8x128xf32>
    %cst_116 = arith.constant 1.000000e+00 : f32
    %268 = vector.broadcast %cst_116 : f32 to vector<8x128xf32>
    %269 = arith.addf %268, %267 : vector<8x128xf32>
    %270 = arith.divf %268, %269 : vector<8x128xf32>
    %271 = vector.extract_strided_slice %261 {offsets = [0, 128], sizes = [8, 128], strides = [1, 1]} : vector<8x512xf32> to vector<8x128xf32>
    %c0_117 = arith.constant 0 : index
    %c128_118 = arith.constant 128 : index
    %272 = vector.load %arg3[%c0_117, %c128_118] : memref<128x512xf32, #tpu.memory_space<vmem>>, vector<128x128xf32>
    %cst_119 = arith.constant dense<0.000000e+00> : vector<8x128xf32>
    %273 = tpu.matmul %257, %272, %cst_119 {dimension_numbers = #tpu.dot_dimension_numbers<[1], [0], [0], [1], [0, 0, 1, 1], [], []>} : vector<8x128xf32>, vector<128x128xf32>, vector<8x128xf32> -> vector<8x128xf32>
    %274 = arith.addf %271, %273 : vector<8x128xf32>
    %275 = arith.negf %274 : vector<8x128xf32>
    %276 = math.exp %275 : vector<8x128xf32>
    %cst_120 = arith.constant 1.000000e+00 : f32
    %277 = vector.broadcast %cst_120 : f32 to vector<8x128xf32>
    %278 = arith.addf %277, %276 : vector<8x128xf32>
    %279 = arith.divf %277, %278 : vector<8x128xf32>
    %280 = vector.extract_strided_slice %261 {offsets = [0, 256], sizes = [8, 128], strides = [1, 1]} : vector<8x512xf32> to vector<8x128xf32>
    %c0_121 = arith.constant 0 : index
    %c256_122 = arith.constant 256 : index
    %281 = vector.load %arg3[%c0_121, %c256_122] : memref<128x512xf32, #tpu.memory_space<vmem>>, vector<128x128xf32>
    %cst_123 = arith.constant dense<0.000000e+00> : vector<8x128xf32>
    %282 = tpu.matmul %257, %281, %cst_123 {dimension_numbers = #tpu.dot_dimension_numbers<[1], [0], [0], [1], [0, 0, 1, 1], [], []>} : vector<8x128xf32>, vector<128x128xf32>, vector<8x128xf32> -> vector<8x128xf32>
    %283 = arith.addf %280, %282 : vector<8x128xf32>
    %284 = math.tanh %283 : vector<8x128xf32>
    %285 = vector.extract_strided_slice %261 {offsets = [0, 384], sizes = [8, 128], strides = [1, 1]} : vector<8x512xf32> to vector<8x128xf32>
    %c0_124 = arith.constant 0 : index
    %c384_125 = arith.constant 384 : index
    %286 = vector.load %arg3[%c0_124, %c384_125] : memref<128x512xf32, #tpu.memory_space<vmem>>, vector<128x128xf32>
    %cst_126 = arith.constant dense<0.000000e+00> : vector<8x128xf32>
    %287 = tpu.matmul %257, %286, %cst_126 {dimension_numbers = #tpu.dot_dimension_numbers<[1], [0], [0], [1], [0, 0, 1, 1], [], []>} : vector<8x128xf32>, vector<128x128xf32>, vector<8x128xf32> -> vector<8x128xf32>
    %288 = arith.addf %285, %287 : vector<8x128xf32>
    %289 = arith.negf %288 : vector<8x128xf32>
    %290 = math.exp %289 : vector<8x128xf32>
    %cst_127 = arith.constant 1.000000e+00 : f32
    %291 = vector.broadcast %cst_127 : f32 to vector<8x128xf32>
    %292 = arith.addf %291, %290 : vector<8x128xf32>
    %293 = arith.divf %291, %292 : vector<8x128xf32>
    %294 = arith.mulf %279, %255 : vector<8x128xf32>
    %295 = arith.mulf %270, %284 : vector<8x128xf32>
    %296 = arith.addf %294, %295 : vector<8x128xf32>
    %297 = math.tanh %296 : vector<8x128xf32>
    %298 = arith.mulf %293, %297 : vector<8x128xf32>
    %c7_i32 = arith.constant 7 : i32
    %c8_i32_128 = arith.constant 8 : i32
    %299 = arith.muli %c7_i32, %c8_i32_128 : i32
    %300 = tpu.assume_multiple %299, 8 : i32
    %301 = arith.index_cast %300 : i32 to index
    %c0_129 = arith.constant 0 : index
    %302 = vector.load %arg8[%301, %c0_129] : memref<64x512xf32, #tpu.memory_space<vmem>>, vector<8x512xf32>
    %303 = vector.extract_strided_slice %302 {offsets = [0, 0], sizes = [8, 128], strides = [1, 1]} : vector<8x512xf32> to vector<8x128xf32>
    %c0_130 = arith.constant 0 : index
    %c0_131 = arith.constant 0 : index
    %304 = vector.load %arg3[%c0_130, %c0_131] : memref<128x512xf32, #tpu.memory_space<vmem>>, vector<128x128xf32>
    %cst_132 = arith.constant dense<0.000000e+00> : vector<8x128xf32>
    %305 = tpu.matmul %298, %304, %cst_132 {dimension_numbers = #tpu.dot_dimension_numbers<[1], [0], [0], [1], [0, 0, 1, 1], [], []>} : vector<8x128xf32>, vector<128x128xf32>, vector<8x128xf32> -> vector<8x128xf32>
    %306 = arith.addf %303, %305 : vector<8x128xf32>
    %307 = arith.negf %306 : vector<8x128xf32>
    %308 = math.exp %307 : vector<8x128xf32>
    %cst_133 = arith.constant 1.000000e+00 : f32
    %309 = vector.broadcast %cst_133 : f32 to vector<8x128xf32>
    %310 = arith.addf %309, %308 : vector<8x128xf32>
    %311 = arith.divf %309, %310 : vector<8x128xf32>
    %312 = vector.extract_strided_slice %302 {offsets = [0, 128], sizes = [8, 128], strides = [1, 1]} : vector<8x512xf32> to vector<8x128xf32>
    %c0_134 = arith.constant 0 : index
    %c128_135 = arith.constant 128 : index
    %313 = vector.load %arg3[%c0_134, %c128_135] : memref<128x512xf32, #tpu.memory_space<vmem>>, vector<128x128xf32>
    %cst_136 = arith.constant dense<0.000000e+00> : vector<8x128xf32>
    %314 = tpu.matmul %298, %313, %cst_136 {dimension_numbers = #tpu.dot_dimension_numbers<[1], [0], [0], [1], [0, 0, 1, 1], [], []>} : vector<8x128xf32>, vector<128x128xf32>, vector<8x128xf32> -> vector<8x128xf32>
    %315 = arith.addf %312, %314 : vector<8x128xf32>
    %316 = arith.negf %315 : vector<8x128xf32>
    %317 = math.exp %316 : vector<8x128xf32>
    %cst_137 = arith.constant 1.000000e+00 : f32
    %318 = vector.broadcast %cst_137 : f32 to vector<8x128xf32>
    %319 = arith.addf %318, %317 : vector<8x128xf32>
    %320 = arith.divf %318, %319 : vector<8x128xf32>
    %321 = vector.extract_strided_slice %302 {offsets = [0, 256], sizes = [8, 128], strides = [1, 1]} : vector<8x512xf32> to vector<8x128xf32>
    %c0_138 = arith.constant 0 : index
    %c256_139 = arith.constant 256 : index
    %322 = vector.load %arg3[%c0_138, %c256_139] : memref<128x512xf32, #tpu.memory_space<vmem>>, vector<128x128xf32>
    %cst_140 = arith.constant dense<0.000000e+00> : vector<8x128xf32>
    %323 = tpu.matmul %298, %322, %cst_140 {dimension_numbers = #tpu.dot_dimension_numbers<[1], [0], [0], [1], [0, 0, 1, 1], [], []>} : vector<8x128xf32>, vector<128x128xf32>, vector<8x128xf32> -> vector<8x128xf32>
    %324 = arith.addf %321, %323 : vector<8x128xf32>
    %325 = math.tanh %324 : vector<8x128xf32>
    %326 = vector.extract_strided_slice %302 {offsets = [0, 384], sizes = [8, 128], strides = [1, 1]} : vector<8x512xf32> to vector<8x128xf32>
    %c0_141 = arith.constant 0 : index
    %c384_142 = arith.constant 384 : index
    %327 = vector.load %arg3[%c0_141, %c384_142] : memref<128x512xf32, #tpu.memory_space<vmem>>, vector<128x128xf32>
    %cst_143 = arith.constant dense<0.000000e+00> : vector<8x128xf32>
    %328 = tpu.matmul %298, %327, %cst_143 {dimension_numbers = #tpu.dot_dimension_numbers<[1], [0], [0], [1], [0, 0, 1, 1], [], []>} : vector<8x128xf32>, vector<128x128xf32>, vector<8x128xf32> -> vector<8x128xf32>
    %329 = arith.addf %326, %328 : vector<8x128xf32>
    %330 = arith.negf %329 : vector<8x128xf32>
    %331 = math.exp %330 : vector<8x128xf32>
    %cst_144 = arith.constant 1.000000e+00 : f32
    %332 = vector.broadcast %cst_144 : f32 to vector<8x128xf32>
    %333 = arith.addf %332, %331 : vector<8x128xf32>
    %334 = arith.divf %332, %333 : vector<8x128xf32>
    %335 = arith.mulf %320, %296 : vector<8x128xf32>
    %336 = arith.mulf %311, %325 : vector<8x128xf32>
    %337 = arith.addf %335, %336 : vector<8x128xf32>
    %338 = math.tanh %337 : vector<8x128xf32>
    %339 = arith.mulf %334, %338 : vector<8x128xf32>
    %c8_i32_145 = arith.constant 8 : i32
    %c0_146 = arith.constant 0 : index
    %c0_147 = arith.constant 0 : index
    %340 = vector.load %arg9[%c0_146, %c0_147] : memref<8x128xf32, #tpu.memory_space<vmem>>, vector<8x128xf32>
    tpu.vector_store %arg9[%c0_146, %c0_147], %339 {strides = array<i32>} : memref<8x128xf32, #tpu.memory_space<vmem>>, vector<8x128xf32>,
    %c0_148 = arith.constant 0 : index
    %c0_149 = arith.constant 0 : index
    %341 = vector.load %arg10[%c0_148, %c0_149] : memref<8x128xf32, #tpu.memory_space<vmem>>, vector<8x128xf32>
    tpu.vector_store %arg10[%c0_148, %c0_149], %337 {strides = array<i32>} : memref<8x128xf32, #tpu.memory_space<vmem>>, vector<8x128xf32>,
    %c0_i32_150 = arith.constant 0 : i32
    %342 = arith.cmpi eq, %arg0, %c0_i32_150 : i32
    %343 = arith.extui %342 : i1 to i32
    %c0_i32_151 = arith.constant 0 : i32
    %344 = arith.cmpi ne, %343, %c0_i32_151 : i32
    scf.if %344 {
      %c0_152 = arith.constant 0 : index
      %c0_153 = arith.constant 0 : index
      %345 = vector.load %arg5[%c0_152, %c0_153] : memref<128x128xf32, #tpu.memory_space<vmem>>, vector<128x128xf32>
      %cst_154 = arith.constant dense<0.000000e+00> : vector<8x128xf32>
      %346 = tpu.matmul %339, %345, %cst_154 {dimension_numbers = #tpu.dot_dimension_numbers<[1], [0], [0], [1], [0, 0, 1, 1], [], []>} : vector<8x128xf32>, vector<128x128xf32>, vector<8x128xf32> -> vector<8x128xf32>
      %c0_155 = arith.constant 0 : index
      %c0_156 = arith.constant 0 : index
      %347 = vector.load %arg6[%c0_155, %c0_156] : memref<1x128xf32, #tpu.memory_space<vmem>>, vector<1x128xf32>
      %348 = vector.broadcast %347 : vector<1x128xf32> to vector<8x128xf32>
      %349 = arith.addf %346, %348 : vector<8x128xf32>
      %350 = arith.negf %349 : vector<8x128xf32>
      %351 = math.exp %350 : vector<8x128xf32>
      %cst_157 = arith.constant 1.000000e+00 : f32
      %352 = vector.broadcast %cst_157 : f32 to vector<8x128xf32>
      %353 = arith.addf %352, %351 : vector<8x128xf32>
      %354 = arith.divf %352, %353 : vector<8x128xf32>
      %c0_158 = arith.constant 0 : index
      %c0_159 = arith.constant 0 : index
      %355 = vector.load %arg7[%c0_158, %c0_159] : memref<8x128xf32, #tpu.memory_space<vmem>>, vector<8x128xf32>
      tpu.vector_store %arg7[%c0_158, %c0_159], %354 {strides = array<i32>} : memref<8x128xf32, #tpu.memory_space<vmem>>, vector<8x128xf32>,
    } else {
    }
    return
  }
  func.func @transform_0(%arg0: i32) -> (i32, i32) {
    %c0_i32 = arith.constant 0 : i32
    %c0_i32_0 = arith.constant 0 : i32
    return %arg0, %c0_i32 : i32, i32
  }
  func.func @transform_1(%arg0: i32) -> (i32, i32) {
    %c0_i32 = arith.constant 0 : i32
    %c0_i32_0 = arith.constant 0 : i32
    %c0_i32_1 = arith.constant 0 : i32
    return %c0_i32, %c0_i32_0 : i32, i32
  }
  func.func @transform_2(%arg0: i32) -> (i32, i32) {
    %c0_i32 = arith.constant 0 : i32
    %c0_i32_0 = arith.constant 0 : i32
    %c0_i32_1 = arith.constant 0 : i32
    return %c0_i32, %c0_i32_0 : i32, i32
  }
  func.func @transform_3(%arg0: i32) -> (i32, i32) {
    %c0_i32 = arith.constant 0 : i32
    %c0_i32_0 = arith.constant 0 : i32
    %c0_i32_1 = arith.constant 0 : i32
    return %c0_i32, %c0_i32_0 : i32, i32
  }
  func.func @transform_4(%arg0: i32) -> (i32, i32) {
    %c0_i32 = arith.constant 0 : i32
    %c0_i32_0 = arith.constant 0 : i32
    %c0_i32_1 = arith.constant 0 : i32
    return %c0_i32, %c0_i32_0 : i32, i32
  }
  func.func @transform_5(%arg0: i32) -> (i32, i32) {
    %c0_i32 = arith.constant 0 : i32
    %c0_i32_0 = arith.constant 0 : i32
    %c0_i32_1 = arith.constant 0 : i32
    return %c0_i32, %c0_i32_0 : i32, i32
  }
  func.func @transform_6(%arg0: i32) -> (i32, i32) {
    %c0_i32 = arith.constant 0 : i32
    %c0_i32_0 = arith.constant 0 : i32
    %c0_i32_1 = arith.constant 0 : i32
    return %c0_i32, %c0_i32_0 : i32, i32
  }
}

</mosaic_0001>

<bundles_post_ra>
// kernel: lstm_model_forward.1
= control target key start
LH: loop header
LB: loop body
LE: loop exit
PB: predicated region body
PF: predicated region fallthrough
CT: control target
= control target key end

     0   :  { %vm90_vm0 = vcmask 1043456   ;;  %v6908_v2 = vmov 0.0   ;;  %vm65_vm1 = vcmask 31744   ;;  %v6910_v16 = vmov 0.0|0.0   ;;  %s6901_s1 = inlined_call_operand.vmem [shape: f32[4,512], index: 1, kind: input, shape index: {}]   ;;  %s6902_s0 = inlined_call_operand.vmem [shape: f32[64,4], index: 0, kind: input, shape index: {}]   ;;  %s6903_s2 = inlined_call_operand.vmem [shape: f32[128,512], index: 2, kind: input, shape index: {}]   ;;  %s6904_s3 = inlined_call_operand.vmem [shape: f32[1,512], index: 3, kind: input, shape index: {}]   ;;  %s6905_s4 = inlined_call_operand.vmem [shape: f32[128,128], index: 4, kind: input, shape index: {}]   ;;  %s6906_s5 = inlined_call_operand.vmem [shape: f32[1,128], index: 5, kind: input, shape index: {}]   ;;  %s6907_s6 = inlined_call_operand.vmem [shape: f32[8,128], index: 6, kind: output, shape index: {}]  }
   0x1   :  { %v37_v0 = vld [vmem:[%s6901_s1] sm:$0xff]  ;;  %v38_v1 = vld [vmem:[%s6901_s1 + $0x8] sm:$0xff]  ;;  %163 = vmatprep.mubr.f32.mxu0 %v6908_v2  ;;  %276 = vmatprep.mubr.f32.mxu1 %v6908_v2  ;;  %v31_v24 = vld [vmem:[%s6902_s0 + $0x10] sm:$0xff]  ;;  %vm5752_vm2 = vmmov 0  }
   0x2   :  { %v63_v3 = vcombine.high %v37_v0, %v37_v0  ;;  %v64_v4 = vcombine.high %v38_v1, %v38_v1  ;;  %v366_v5 = vld [vmem:[%s6903_s2] sm:$0xff]  ;;  %v459_v7 = vld [vmem:[%s6903_s2 + $0x8] sm:$0xff]  ;;  %v32_v31 = vld [vmem:[%s6902_s0 + $0x18] sm:$0xff] }
   0x3   :  { %v367_v6 = vld [vmem:[%s6903_s2 + $0x20] sm:$0xff]  ;;  %v460_v9 = vld [vmem:[%s6903_s2 + $0x28] sm:$0xff]  ;;  %v35_v52 = vld [vmem:[%s6902_s0 + $0x30] sm:$0xff] }
   0x4   :  { %v29_v8 = vld [vmem:[%s6902_s0] sm:$0xff]  ;;  %3059 = vmatprep.subr.msk.mxu0 %vm90_vm0, %v63_v3  ;;  %3069 = vmatprep.subr.msk.mxu1 %vm90_vm0, %v64_v4  ;;  %v5813_v10 = vpack.c.bf16 %v367_v6, %v366_v5  ;;  %v5815_v11 = vpack.c.bf16 %v460_v9, %v459_v7  ;;  %v461_v14 = vld [vmem:[%s6903_s2 + $0x48] sm:$0xff]  ;;  %v36_v59 = vld [vmem:[%s6902_s0 + $0x38] sm:$0xff] }
   0x5   :  { %v368_v12 = vld [vmem:[%s6903_s2 + $0x40] sm:$0xff]  ;;  %3060 = vmatpush1.msk.msra.mxu0 %vm90_vm0, %v37_v0  ;;  %3070 = vmatpush1.msk.msra.mxu1 %vm90_vm0, %v38_v1  ;;  %v462_v15 = vld [vmem:[%s6903_s2 + $0x68] sm:$0xff]  ;;  %v552_v62 = vld [vmem:[%s6903_s2 + $0x10] sm:$0xff] }
   0x6   :  { %v369_v13 = vld [vmem:[%s6903_s2 + $0x60] sm:$0xff]  ;;  %3061 = vmatmul.mubr.msk.f32.vlgmr.msra.gmra.mrb[0].mxu0 %vm65_vm1, %v29_v8  ;;  %3071 = vmatmul.mubr.msk.f32.vlgmr.msra.gmra.mrb[0].mxu1 %vm65_vm1, %v29_v8  ;;  %v30_v17 = vld [vmem:[%s6902_s0 + $0x8] sm:$0xff]  ;;  %v5842_v19 = vpack.c.bf16 %v462_v15, %v461_v14  ;;  %v553_v63 = vld [vmem:[%s6903_s2 + $0x30] sm:$0xff] }
   0x7   :  { %4821 = vmatprep.subr.bf16.mxu0 %v6910_v16  ;;  %4845 = vmatprep.subr.bf16.mxu1 %v6910_v16  ;;  %v5840_v18 = vpack.c.bf16 %v369_v13, %v368_v12  ;;  %v370_v20 = vld [vmem:[%s6903_s2 + $0x80] sm:$0xff]  ;;  %v463_v22 = vld [vmem:[%s6903_s2 + $0x88] sm:$0xff]  ;;  %v640_v0 = vld [vmem:[%s6903_s2 + $0x18] sm:$0xff]  ;;  %v6026_v3 = vpack.c.bf16 %v553_v63, %v552_v62 }
   0x8   :  { %4823 = vmatpush3.bf16.msra.mxu0 %v5813_v10  ;;  %4847 = vmatpush3.bf16.msra.mxu1 %v5815_v11  ;;  %v371_v21 = vld [vmem:[%s6903_s2 + $0xa0] sm:$0xff]  ;;  %v464_v23 = vld [vmem:[%s6903_s2 + $0xa8] sm:$0xff]  ;;  %v641_v1 = vld [vmem:[%s6903_s2 + $0x38] sm:$0xff] }
   0x9   :  { %169 = vmatprep.mubr.f32.mxu0 %v6908_v2  ;;  %282 = vmatprep.mubr.f32.mxu1 %v6908_v2  ;;  %v5867_v25 = vpack.c.bf16 %v371_v21, %v370_v20  ;;  %v5869_v26 = vpack.c.bf16 %v464_v23, %v463_v22  ;;  %v372_v27 = vld [vmem:[%s6903_s2 + $0xc0] sm:$0xff]  ;;  %v465_v29 = vld [vmem:[%s6903_s2 + $0xc8] sm:$0xff]  ;;  %v6028_v4 = vpack.c.bf16 %v641_v1, %v640_v0  ;;  %v554_v5 = vld [vmem:[%s6903_s2 + $0x50] sm:$0xff]  ;;  %v41_v0 = vlaneseq }
   0xa   :  { %3062 = vmatmul.mubr.msk.f32.gmra.mrb[2].mxu0 %vm65_vm1, %v30_v17  ;;  %3072 = vmatmul.mubr.msk.f32.gmra.mrb[2].mxu1 %vm65_vm1, %v30_v17  ;;  %v373_v28 = vld [vmem:[%s6903_s2 + $0xe0] sm:$0xff]  ;;  %v466_v30 = vld [vmem:[%s6903_s2 + $0xe8] sm:$0xff]  ;;  %v555_v6 = vld [vmem:[%s6903_s2 + $0x70] sm:$0xff] }
   0xb   :  { %4824 = vmatprep.subr.bf16.mxu0 %v6910_v16  ;;  %4848 = vmatprep.subr.bf16.mxu1 %v6910_v16  ;;  %v5894_v32 = vpack.c.bf16 %v373_v28, %v372_v27  ;;  %v5896_v33 = vpack.c.bf16 %v466_v30, %v465_v29  ;;  %v374_v34 = vld [vmem:[%s6903_s2 + $0x100] sm:$0xff]  ;;  %v467_v36 = vld [vmem:[%s6903_s2 + $0x108] sm:$0xff]  ;;  %v642_v7 = vld [vmem:[%s6903_s2 + $0x58] sm:$0xff]  ;;  %v6052_v9 = vpack.c.bf16 %v555_v6, %v554_v5  ;;  %v42_v1 = vshrl.u32 %v41_v0, 7 }
   0xc   :  { %4826 = vmatpush3.bf16.msra.mxu0 %v5840_v18  ;;  %4850 = vmatpush3.bf16.msra.mxu1 %v5842_v19  ;;  %v375_v35 = vld [vmem:[%s6903_s2 + $0x120] sm:$0xff]  ;;  %v468_v37 = vld [vmem:[%s6903_s2 + $0x128] sm:$0xff]  ;;  %v643_v8 = vld [vmem:[%s6903_s2 + $0x78] sm:$0xff] }
   0xd   :  { %175 = vmatprep.mubr.f32.mxu0 %v6908_v2  ;;  %288 = vmatprep.mubr.f32.mxu1 %v6908_v2  ;;  %v33_v38 = vld [vmem:[%s6902_s0 + $0x20] sm:$0xff]  ;;  %v5921_v39 = vpack.c.bf16 %v375_v35, %v374_v34  ;;  %v5923_v40 = vpack.c.bf16 %v468_v37, %v467_v36  ;;  %v469_v43 = vld [vmem:[%s6903_s2 + $0x148] sm:$0xff]  ;;  %v6054_v12 = vpack.c.bf16 %v643_v8, %v642_v7  ;;  %v556_v13 = vld [vmem:[%s6903_s2 + $0x90] sm:$0xff]  ;;  %v43_v5 = vsub.s32 0, %v42_v1 }
   0xe   :  { %3063 = vmatmul.mubr.msk.f32.gmra.mrb[4].mxu0 %vm65_vm1, %v31_v24  ;;  %3073 = vmatmul.mubr.msk.f32.gmra.mrb[4].mxu1 %vm65_vm1, %v31_v24  ;;  %v376_v41 = vld [vmem:[%s6903_s2 + $0x140] sm:$0xff]  ;;  %v470_v44 = vld [vmem:[%s6903_s2 + $0x168] sm:$0xff]  ;;  %v557_v14 = vld [vmem:[%s6903_s2 + $0xb0] sm:$0xff]  ;;  %v51_v6 = vsub.s32 2, %v42_v1 }
   0xf   :  { %4827 = vmatprep.subr.bf16.mxu0 %v6910_v16  ;;  %4851 = vmatprep.subr.bf16.mxu1 %v6910_v16  ;;  %v377_v42 = vld [vmem:[%s6903_s2 + $0x160] sm:$0xff]  ;;  %v34_v45 = vld [vmem:[%s6902_s0 + $0x28] sm:$0xff]  ;;  %v5950_v47 = vpack.c.bf16 %v470_v44, %v469_v43  ;;  %v644_v15 = vld [vmem:[%s6903_s2 + $0x98] sm:$0xff]  ;;  %v6076_v20 = vpack.c.bf16 %v557_v14, %v556_v13  ;;  %v47_v14 = vsub.s32 1, %v42_v1 }
  0x10   :  { %4829 = vmatpush3.bf16.msra.mxu0 %v5867_v25  ;;  %4853 = vmatpush3.bf16.msra.mxu1 %v5869_v26  ;;  %v5948_v46 = vpack.c.bf16 %v377_v42, %v376_v41  ;;  %v378_v48 = vld [vmem:[%s6903_s2 + $0x180] sm:$0xff]  ;;  %v471_v50 = vld [vmem:[%s6903_s2 + $0x188] sm:$0xff]  ;;  %v645_v17 = vld [vmem:[%s6903_s2 + $0xb8] sm:$0xff] }
  0x11   :  { %181 = vmatprep.mubr.f32.mxu0 %v6908_v2  ;;  %294 = vmatprep.mubr.f32.mxu1 %v6908_v2  ;;  %v379_v49 = vld [vmem:[%s6903_s2 + $0x1a0] sm:$0xff]  ;;  %v472_v51 = vld [vmem:[%s6903_s2 + $0x1a8] sm:$0xff]  ;;  %v6078_v21 = vpack.c.bf16 %v645_v17, %v644_v15  ;;  %v558_v22 = vld [vmem:[%s6903_s2 + $0xd0] sm:$0xff]  ;;  %v55_v15 = vsub.s32 3, %v42_v1 }
  0x12   :  { %3064 = vmatmul.mubr.msk.f32.gmra.mrb[6].mxu0 %vm65_vm1, %v32_v31  ;;  %3074 = vmatmul.mubr.msk.f32.gmra.mrb[6].mxu1 %vm65_vm1, %v32_v31  ;;  %v5975_v53 = vpack.c.bf16 %v379_v49, %v378_v48  ;;  %v5977_v54 = vpack.c.bf16 %v472_v51, %v471_v50  ;;  %v380_v55 = vld [vmem:[%s6903_s2 + $0x1c0] sm:$0xff]  ;;  %v473_v57 = vld [vmem:[%s6903_s2 + $0x1c8] sm:$0xff]  ;;  %v559_v23 = vld [vmem:[%s6903_s2 + $0xf0] sm:$0xff] }
  0x13   :  { %4830 = vmatprep.subr.bf16.mxu0 %v6910_v16  ;;  %4854 = vmatprep.subr.bf16.mxu1 %v6910_v16  ;;  %v381_v56 = vld [vmem:[%s6903_s2 + $0x1e0] sm:$0xff]  ;;  %v474_v58 = vld [vmem:[%s6903_s2 + $0x1e8] sm:$0xff]  ;;  %v646_v24 = vld [vmem:[%s6903_s2 + $0xd8] sm:$0xff]  ;;  %v6096_v28 = vpack.c.bf16 %v559_v23, %v558_v22 }
  0x14   :  { %4832 = vmatpush3.bf16.msra.mxu0 %v5894_v32  ;;  %4856 = vmatpush3.bf16.msra.mxu1 %v5896_v33  ;;  %v6002_v60 = vpack.c.bf16 %v381_v56, %v380_v55  ;;  %v6004_v61 = vpack.c.bf16 %v474_v58, %v473_v57  ;;  %v647_v27 = vld [vmem:[%s6903_s2 + $0xf8] sm:$0xff]  ;;  %v560_v30 = vld [vmem:[%s6903_s2 + $0x110] sm:$0xff]  ;;  %v39_v7 = vld [vmem:[%s6904_s3] sm:$0xf] }
  0x15   :  { %187 = vmatprep.mubr.f32.mxu0 %v6908_v2  ;;  %300 = vmatprep.mubr.f32.mxu1 %v6908_v2  ;;  %v6098_v29 = vpack.c.bf16 %v647_v27, %v646_v24  ;;  %v561_v31 = vld [vmem:[%s6903_s2 + $0x130] sm:$0xff]  ;;  %v648_v34 = vld [vmem:[%s6903_s2 + $0x118] sm:$0xff]  ;;  %v44_v23 = vrot.slane %v39_v7, %v43_v5  ;;  %v6235_v24 = vrot.slane %v39_v7, %v51_v6 }
  0x16   :  { %3065 = vmatmul.mubr.msk.f32.gmra.mrb[8].mxu0 %vm65_vm1, %v33_v38  ;;  %3075 = vmatmul.mubr.msk.f32.gmra.mrb[8].mxu1 %vm65_vm1, %v33_v38  ;;  %v649_v35 = vld [vmem:[%s6903_s2 + $0x138] sm:$0xff]  ;;  %v6116_v36 = vpack.c.bf16 %v561_v31, %v560_v30  ;;  %v562_v38 = vld [vmem:[%s6903_s2 + $0x150] sm:$0xff]  ;;  %v48_v27 = vrot.slane %v39_v7, %v47_v14  ;;  %v6237_v30 = vrot.slane %v39_v7, %v55_v15 }
  0x17   :  { %4833 = vmatprep.subr.bf16.mxu0 %v6910_v16  ;;  %4857 = vmatprep.subr.bf16.mxu1 %v6910_v16  ;;  %v6118_v37 = vpack.c.bf16 %v649_v35, %v648_v34  ;;  %v563_v41 = vld [vmem:[%s6903_s2 + $0x170] sm:$0xff]  ;;  %v650_v42 = vld [vmem:[%s6903_s2 + $0x158] sm:$0xff] }
  0x18   :  { %4835 = vmatpush3.bf16.msra.mxu0 %v5921_v39  ;;  %4859 = vmatpush3.bf16.msra.mxu1 %v5923_v40  ;;  %v651_v43 = vld [vmem:[%s6903_s2 + $0x178] sm:$0xff]  ;;  %v6136_v44 = vpack.c.bf16 %v563_v41, %v562_v38  ;;  %v564_v48 = vld [vmem:[%s6903_s2 + $0x190] sm:$0xff] }
  0x19   :  { %193 = vmatprep.mubr.f32.mxu0 %v6908_v2  ;;  %306 = vmatprep.mubr.f32.mxu1 %v6908_v2  ;;  %v565_v49 = vld [vmem:[%s6903_s2 + $0x1b0] sm:$0xff]  ;;  %v652_v50 = vld [vmem:[%s6903_s2 + $0x198] sm:$0xff] }
  0x1a   :  { %3066 = vmatmul.mubr.msk.f32.gmra.mrb[10].mxu0 %vm65_vm1, %v34_v45  ;;  %3076 = vmatmul.mubr.msk.f32.gmra.mrb[10].mxu1 %vm65_vm1, %v34_v45  ;;  %v6138_v45 = vpack.c.bf16 %v651_v43, %v650_v42  ;;  %v653_v51 = vld [vmem:[%s6903_s2 + $0x1b8] sm:$0xff]  ;;  %v566_v56 = vld [vmem:[%s6903_s2 + $0x1d0] sm:$0xff] }
  0x1b   :  { %4836 = vmatprep.subr.bf16.mxu0 %v6910_v16  ;;  %4860 = vmatprep.subr.bf16.mxu1 %v6910_v16  ;;  %v6158_v55 = vpack.c.bf16 %v653_v51, %v652_v50  ;;  %v567_v57 = vld [vmem:[%s6903_s2 + $0x1f0] sm:$0xff]  ;;  %v654_v58 = vld [vmem:[%s6903_s2 + $0x1d8] sm:$0xff] }
  0x1c   :  { %4838 = vmatpush3.bf16.msra.mxu0 %v5948_v46  ;;  %4862 = vmatpush3.bf16.msra.mxu1 %v5950_v47  ;;  %v6176_v62 = vpack.c.bf16 %v567_v57, %v566_v56 }
  0x1d   :  { %199 = vmatprep.mubr.f32.mxu0 %v6908_v2  ;;  %312 = vmatprep.mubr.f32.mxu1 %v6908_v2 }
  0x1e   :  { %3067 = vmatmul.mubr.msk.f32.gmra.mrb[12].mxu0 %vm65_vm1, %v35_v52  ;;  %3077 = vmatmul.mubr.msk.f32.gmra.mrb[12].mxu1 %vm65_vm1, %v35_v52  ;;  %v6156_v52 = vpack.c.bf16 %v565_v49, %v564_v48 }
  0x1f   :  { %4839 = vmatprep.subr.bf16.mxu0 %v6910_v16  ;;  %4863 = vmatprep.subr.bf16.mxu1 %v6910_v16 }
  0x20   :  { %4841 = vmatpush3.bf16.msra.mxu0 %v5975_v53  ;;  %4865 = vmatpush3.bf16.msra.mxu1 %v5977_v54 }
  0x21   :  { %205 = vmatprep.mubr.f32.mxu0 %v6908_v2  ;;  %318 = vmatprep.mubr.f32.mxu1 %v6908_v2 }
  0x22   :  { %3068 = vmatmul.mubr.msk.f32.gmra.mrb[14].mxu0 %vm65_vm1, %v36_v59  ;;  %3078 = vmatmul.mubr.msk.f32.gmra.mrb[14].mxu1 %vm65_vm1, %v36_v59  ;;  %v655_v59 = vld [vmem:[%s6903_s2 + $0x1f8] sm:$0xff] }
  0x23   :  { %4842 = vmatprep.subr.bf16.mxu0 %v6910_v16  ;;  %4866 = vmatprep.subr.bf16.mxu1 %v6910_v16  ;;  %v6178_v63 = vpack.c.bf16 %v655_v59, %v654_v58 }
  0x24   :  { %4844 = vmatpush3.bf16.msra.mxu0 %v6002_v60  ;;  %4868 = vmatpush3.bf16.msra.mxu1 %v6004_v61 }
  0x25   :  { %3698 = vmatprep.mubr.msk.f32.mxu0 %vm5752_vm2, %v6908_v2  ;;  %3733 = vmatprep.mubr.msk.f32.mxu1 %vm5752_vm2, %v6908_v2 }
  0x26   :  { %4869 = vmatprep.subr.bf16.mxu0 %v6910_v16  ;;  %4893 = vmatprep.subr.bf16.mxu1 %v6910_v16 }
  0x27   :  { %3699 = vmatmul.mubr.f32.vlgmr.msra.gmra.mrb[16].mxu0 %v6908_v2  ;;  %3734 = vmatmul.mubr.f32.vlgmr.msra.gmra.mrb[16].mxu1 %v6908_v2 }
  0x28   :  { %4871 = vmatpush3.bf16.msra.mxu0 %v6026_v3  ;;  %4895 = vmatpush3.bf16.msra.mxu1 %v6028_v4 }
  0x29   :  { %4872 = vmatprep.subr.bf16.mxu0 %v6910_v16  ;;  %4896 = vmatprep.subr.bf16.mxu1 %v6910_v16 }
  0x2a   :  { %3768 = vmatprep.mubr.msk.f32.mxu0 %vm5752_vm2, %v6908_v2  ;;  %3803 = vmatprep.mubr.msk.f32.mxu1 %vm5752_vm2, %v6908_v2 }
  0x2c   :  { %4874 = vmatpush3.bf16.msra.mxu0 %v6052_v9  ;;  %4898 = vmatpush3.bf16.msra.mxu1 %v6054_v12 }
  0x2d   :  { %4875 = vmatprep.subr.bf16.mxu0 %v6910_v16  ;;  %4899 = vmatprep.subr.bf16.mxu1 %v6910_v16 }
  0x30   :  { %4877 = vmatpush3.bf16.msra.mxu0 %v6076_v20  ;;  %4901 = vmatpush3.bf16.msra.mxu1 %v6078_v21 }
  0x31   :  { %4878 = vmatprep.subr.bf16.mxu0 %v6910_v16  ;;  %4902 = vmatprep.subr.bf16.mxu1 %v6910_v16 }
  0x34   :  { %4880 = vmatpush3.bf16.msra.mxu0 %v6096_v28  ;;  %4904 = vmatpush3.bf16.msra.mxu1 %v6098_v29 }
  0x35   :  { %4881 = vmatprep.subr.bf16.mxu0 %v6910_v16  ;;  %4905 = vmatprep.subr.bf16.mxu1 %v6910_v16 }
  0x38   :  { %4883 = vmatpush3.bf16.msra.mxu0 %v6116_v36  ;;  %4907 = vmatpush3.bf16.msra.mxu1 %v6118_v37 }
  0x39   :  { %4884 = vmatprep.subr.bf16.mxu0 %v6910_v16  ;;  %4908 = vmatprep.subr.bf16.mxu1 %v6910_v16 }
  0x3c   :  { %4886 = vmatpush3.bf16.msra.mxu0 %v6136_v44  ;;  %4910 = vmatpush3.bf16.msra.mxu1 %v6138_v45 }
  0x3d   :  { %4887 = vmatprep.subr.bf16.mxu0 %v6910_v16  ;;  %4911 = vmatprep.subr.bf16.mxu1 %v6910_v16 }
  0x40   :  { %4889 = vmatpush3.bf16.msra.mxu0 %v6156_v52  ;;  %4913 = vmatpush3.bf16.msra.mxu1 %v6158_v55 }
  0x41   :  { %4890 = vmatprep.subr.bf16.mxu0 %v6910_v16  ;;  %4914 = vmatprep.subr.bf16.mxu1 %v6910_v16 }
  0x44   :  { %4892 = vmatpush3.bf16.msra.mxu0 %v6176_v62  ;;  %4916 = vmatpush3.bf16.msra.mxu1 %v6178_v63 }
  0x45   :  { %4917 = vmatprep.subr.bf16.mxu0 %v6910_v16  ;;  %4941 = vmatprep.subr.bf16.mxu1 %v6910_v16 }
  0x47   :  { %3769 = vmatmul.mubr.f32.vlgmr.msra.gmra.mrb[18].mxu0 %v6908_v2  ;;  %3804 = vmatmul.mubr.f32.vlgmr.msra.gmra.mrb[18].mxu1 %v6908_v2 }
  0x48   :  { %4919 = vmatpush3.bf16.msra.mxu0 %v5813_v10  ;;  %4943 = vmatpush3.bf16.msra.mxu1 %v5815_v11 }
  0x49   :  { %4920 = vmatprep.subr.bf16.mxu0 %v6910_v16  ;;  %4944 = vmatprep.subr.bf16.mxu1 %v6910_v16 }
  0x4a   :  { %3838 = vmatprep.mubr.msk.f32.mxu0 %vm5752_vm2, %v6908_v2  ;;  %3873 = vmatprep.mubr.msk.f32.mxu1 %vm5752_vm2, %v6908_v2 }
  0x4c   :  { %4922 = vmatpush3.bf16.msra.mxu0 %v5840_v18  ;;  %4946 = vmatpush3.bf16.msra.mxu1 %v5842_v19 }
  0x4d   :  { %4923 = vmatprep.subr.bf16.mxu0 %v6910_v16  ;;  %4947 = vmatprep.subr.bf16.mxu1 %v6910_v16 }
  0x50   :  { %4925 = vmatpush3.bf16.msra.mxu0 %v5867_v25  ;;  %4949 = vmatpush3.bf16.msra.mxu1 %v5869_v26 }
  0x51   :  { %4926 = vmatprep.subr.bf16.mxu0 %v6910_v16  ;;  %4950 = vmatprep.subr.bf16.mxu1 %v6910_v16 }
  0x54   :  { %4928 = vmatpush3.bf16.msra.mxu0 %v5894_v32  ;;  %4952 = vmatpush3.bf16.msra.mxu1 %v5896_v33 }
  0x55   :  { %4929 = vmatprep.subr.bf16.mxu0 %v6910_v16  ;;  %4953 = vmatprep.subr.bf16.mxu1 %v6910_v16 }
  0x58   :  { %4931 = vmatpush3.bf16.msra.mxu0 %v5921_v39  ;;  %4955 = vmatpush3.bf16.msra.mxu1 %v5923_v40 }
  0x59   :  { %4932 = vmatprep.subr.bf16.mxu0 %v6910_v16  ;;  %4956 = vmatprep.subr.bf16.mxu1 %v6910_v16 }
  0x5c   :  { %4934 = vmatpush3.bf16.msra.mxu0 %v5948_v46  ;;  %4958 = vmatpush3.bf16.msra.mxu1 %v5950_v47 }
  0x5d   :  { %4935 = vmatprep.subr.bf16.mxu0 %v6910_v16  ;;  %4959 = vmatprep.subr.bf16.mxu1 %v6910_v16 }
  0x60   :  { %4937 = vmatpush3.bf16.msra.mxu0 %v5975_v53  ;;  %4961 = vmatpush3.bf16.msra.mxu1 %v5977_v54 }
  0x61   :  { %4938 = vmatprep.subr.bf16.mxu0 %v6910_v16  ;;  %4962 = vmatprep.subr.bf16.mxu1 %v6910_v16 }
  0x64   :  { %4940 = vmatpush3.bf16.msra.mxu0 %v6002_v60  ;;  %4964 = vmatpush3.bf16.msra.mxu1 %v6004_v61 }
  0x65   :  { %4965 = vmatprep.subr.bf16.mxu0 %v6910_v16  ;;  %4989 = vmatprep.subr.bf16.mxu1 %v6910_v16 }
  0xd9   :  { %v6227_v8 = vpop.f32.mrb[0].mxu0  ;;  %v6229_v13 = vpop.f32.mrb[0].mxu1 }
  0xda   :  { %v6231_v17 = vpop.f32.mrb[1].mxu0  ;;  %v6233_v22 = vpop.f32.mrb[1].mxu1 }
  0xdd   :  { %v171_v31 = vpop.f32.mrb[2].mxu0  ;;  %v284_v34 = vpop.f32.mrb[2].mxu1 }
  0xde   :  { %v6239_v35 = vadd.f32 %v171_v31, %v44_v23  ;;  %v6242_v38 = vadd.f32 %v284_v34, %v6235_v24  ;;  %v173_v41 = vpop.f32.mrb[3].mxu0  ;;  %v286_v42 = vpop.f32.mrb[3].mxu1 }
  0xdf   :  { %v6244_v43 = vadd.f32 %v173_v41, %v48_v27  ;;  %v6247_v48 = vadd.f32 %v286_v42, %v6237_v30 }
  0xe1   :  { %v177_v49 = vpop.f32.mrb[4].mxu0  ;;  %v290_v50 = vpop.f32.mrb[4].mxu1 }
  0xe2   :  { %v6249_v51 = vadd.f32 %v177_v49, %v44_v23  ;;  %v6252_v56 = vadd.f32 %v290_v50, %v6235_v24  ;;  %v179_v57 = vpop.f32.mrb[5].mxu0  ;;  %v292_v58 = vpop.f32.mrb[5].mxu1 }
  0xe3   :  { %v6254_v59 = vadd.f32 %v179_v57, %v48_v27  ;;  %v6257_v0 = vadd.f32 %v292_v58, %v6237_v30 }
  0xe5   :  { %v183_v1 = vpop.f32.mrb[6].mxu0  ;;  %v296_v5 = vpop.f32.mrb[6].mxu1 }
  0xe6   :  { %v6259_v6 = vadd.f32 %v183_v1, %v44_v23  ;;  %v6262_v7 = vadd.f32 %v296_v5, %v6235_v24  ;;  %v185_v14 = vpop.f32.mrb[7].mxu0  ;;  %v298_v15 = vpop.f32.mrb[7].mxu1 }
  0xe7   :  { %v6264_v31 = vadd.f32 %v185_v14, %v48_v27  ;;  %v6267_v34 = vadd.f32 %v298_v15, %v6237_v30 }
  0xe8   :  { %6912 = vst [vmem:[#allocation5_spill] sm:$0xff] %v6259_v6  ;;  %6913 = vst [vmem:[#allocation6_spill] sm:$0xff] %v6262_v7 }
  0xe9   :  { %6914 = vst [vmem:[#allocation7_spill] sm:$0xff] %v6264_v31  ;;  %6915 = vst [vmem:[#allocation8_spill] sm:$0xff] %v6267_v34  ;;  %v189_v41 = vpop.f32.mrb[8].mxu0  ;;  %v302_v42 = vpop.f32.mrb[8].mxu1 }
  0xea   :  { %v6269_v49 = vadd.f32 %v189_v41, %v44_v23  ;;  %v6272_v50 = vadd.f32 %v302_v42, %v6235_v24  ;;  %v191_v57 = vpop.f32.mrb[9].mxu0  ;;  %v304_v58 = vpop.f32.mrb[9].mxu1 }
  0xeb   :  { %v6274_v1 = vadd.f32 %v191_v57, %v48_v27  ;;  %v6277_v5 = vadd.f32 %v304_v58, %v6237_v30 }
  0xec   :  { %6916 = vst [vmem:[#allocation9_spill] sm:$0xff] %v6269_v49  ;;  %6917 = vst [vmem:[#allocation10_spill] sm:$0xff] %v6272_v50 }
  0xed   :  { %6918 = vst [vmem:[#allocation11_spill] sm:$0xff] %v6274_v1  ;;  %6919 = vst [vmem:[#allocation12_spill] sm:$0xff] %v6277_v5  ;;  %v195_v2 = vpop.f32.mrb[10].mxu0  ;;  %v308_v14 = vpop.f32.mrb[10].mxu1 }
  0xee   :  { %v6279_v16 = vadd.f32 %v195_v2, %v44_v23  ;;  %v6282_v15 = vadd.f32 %v308_v14, %v6235_v24  ;;  %v197_v34 = vpop.f32.mrb[11].mxu0  ;;  %v310_v41 = vpop.f32.mrb[11].mxu1 }
  0xef   :  { %v6284_v49 = vadd.f32 %v197_v34, %v48_v27  ;;  %v6287_v42 = vadd.f32 %v310_v41, %v6237_v30 }
  0xf0   :  { %6920 = vst [vmem:[#allocation13_spill] sm:$0xff] %v6279_v16  ;;  %6921 = vst [vmem:[#allocation14_spill] sm:$0xff] %v6282_v15 }
  0xf1   :  { %6922 = vst [vmem:[#allocation15_spill] sm:$0xff] %v6284_v49  ;;  %6923 = vst [vmem:[#allocation16_spill] sm:$0xff] %v6287_v42  ;;  %v201_v50 = vpop.f32.mrb[12].mxu0  ;;  %v314_v57 = vpop.f32.mrb[12].mxu1 }
  0xf2   :  { %v6289_v1 = vadd.f32 %v201_v50, %v44_v23  ;;  %v6292_v58 = vadd.f32 %v314_v57, %v6235_v24  ;;  %v203_v5 = vpop.f32.mrb[13].mxu0  ;;  %v316_v2 = vpop.f32.mrb[13].mxu1 }
  0xf3   :  { %v6294_v16 = vadd.f32 %v203_v5, %v48_v27  ;;  %v6297_v14 = vadd.f32 %v316_v2, %v6237_v30  ;;  %v166_v5 = vadd.f32 %v6227_v8, %v44_v23  ;;  %v281_v8 = vadd.f32 %v6233_v22, %v6237_v30 }
  0xf4   :  { %6924 = vst [vmem:[#allocation17_spill] sm:$0xff] %v6289_v1  ;;  %6925 = vst [vmem:[#allocation18_spill] sm:$0xff] %v6292_v58  ;;  %v168_v58 = vadd.f32 %v6231_v17, %v48_v27 }
  0xf5   :  { %6926 = vst [vmem:[#allocation19_spill] sm:$0xff] %v6294_v16  ;;  %6927 = vst [vmem:[#allocation20_spill] sm:$0xff] %v6297_v14  ;;  %v207_v15 = vpop.f32.mrb[14].mxu0  ;;  %v320_v34 = vpop.f32.mrb[14].mxu1 }
  0xf6   :  { %v6299_v49 = vadd.f32 %v207_v15, %v44_v23  ;;  %v6302_v41 = vadd.f32 %v320_v34, %v6235_v24  ;;  %v209_v42 = vpop.f32.mrb[15].mxu0  ;;  %v322_v50 = vpop.f32.mrb[15].mxu1 }
  0xf7   :  { %v6304_v1 = vadd.f32 %v209_v42, %v48_v27  ;;  %v6307_v57 = vadd.f32 %v322_v50, %v6237_v30  ;;  %v279_v50 = vadd.f32 %v6229_v13, %v6235_v24 }
  0xf8   :  { %6928 = vst [vmem:[#allocation21_spill] sm:$0xff] %v6299_v49  ;;  %6929 = vst [vmem:[#allocation22_spill] sm:$0xff] %v6302_v41 }
  0xf9   :  { %6930 = vst [vmem:[#allocation23_spill] sm:$0xff] %v6304_v1 }
  0xfa   :  { %v448_v2 = vpop.f32.mrb[16].mxu0  ;;  %v541_v14 = vpop.f32.mrb[16].mxu1 }
  0xfb   :  { %v452_v16 = vadd.f32 %v448_v2, %v166_v5  ;;  %v545_v7 = vadd.f32 %v541_v14, %v168_v58  ;;  %v3700_v15 = vpop.f32.mrb[17].mxu0  ;;  %v3735_v49 = vpop.f32.mrb[17].mxu1 }
  0xfd   :  { %v3080_v31 = vmul.f32 -1.442695, %v545_v7  ;;  %v3079_v34 = vmul.f32 -1.442695, %v452_v16 }
  0xff   :  { %5618 = vpow2.f32 %v3080_v31 }
 0x100   :  { %5620 = vpow2.f32 %v3079_v34  ;;  %v6932_v34 = vmov 0.0  }
 0x109   :  { %v5619_v41 = vpop.eup %5618 }
 0x10a   :  { %v5621_v42 = vpop.eup %5620  ;;  %v549_v1 = vadd.f32 1.0, %v5619_v41 }
 0x10b   :  { %v456_v6 = vadd.f32 1.0, %v5621_v42 }
 0x10c   :  { %5622 = vrcp.f32 %v549_v1 }
 0x10d   :  { %5624 = vrcp.f32 %v456_v6  ;;  %v6931_v6 = vmov 0.0|0.0  }
 0x116   :  { %v5623_v31 = vpop.eup %5622 }
 0x117   :  { %v5625_v14 = vpop.eup %5624  ;;  %v733_v5 = vmul.f32 0.0, %v5623_v31 }
 0x11a   :  { %v634_v17 = vpop.f32.mrb[18].mxu0  ;;  %v722_v23 = vpop.f32.mrb[18].mxu1 }
 0x11b   :  { %v638_v27 = vadd.f32 %v634_v17, %v279_v50  ;;  %v726_v58 = vadd.f32 %v722_v23, %v281_v8  ;;  %v3770_v49 = vpop.f32.mrb[19].mxu0  ;;  %v3805_v7 = vpop.f32.mrb[19].mxu1 }
 0x11d   :  { %5626 = vtanh.f32 %v638_v27  ;;  %v3081_v16 = vmul.f32 -1.442695, %v726_v58 }
 0x11f   :  { %5628 = vpow2.f32 %v3081_v16 }
 0x127   :  { %v5627_v41 = vpop.eup %5626 }
 0x128   :  { %v734_v2 = vmul.f32 %v5627_v41, %v5625_v14 }
 0x129   :  { %v5629_v13 = vpop.eup %5628 }
 0x12a   :  { %v6315_v24 = vadd.f32 %v734_v2, %v733_v5  ;;  %v730_v22 = vadd.f32 1.0, %v5629_v13 }
 0x12c   :  { %5630 = vtanh.f32 %v6315_v24 }
 0x12d   :  { %5632 = vrcp.f32 %v730_v22 }
 0x136   :  { %v5631_v30 = vpop.eup %5630 }
 0x137   :  { %v5633_v1 = vpop.eup %5632 }
 0x138   :  { %v737_v15 = vmul.f32 %v5633_v1, %v5631_v30 }
 0x13a   :  { %3839 = vmatmul.mubr.f32.vlgmr.msra.gmra.mrb[20].mxu0 %v737_v15  ;;  %3874 = vmatmul.mubr.f32.vlgmr.msra.gmra.mrb[20].mxu1 %v737_v15 }
 0x13b   :  { %4967 = vmatpush3.bf16.msra.mxu0 %v6026_v3  ;;  %4991 = vmatpush3.bf16.msra.mxu1 %v6028_v4 }
 0x13c   :  { %4968 = vmatprep.subr.bf16.mxu0 %v6931_v6  ;;  %4992 = vmatprep.subr.bf16.mxu1 %v6931_v6 }
 0x13d   :  { %3908 = vmatprep.mubr.msk.f32.mxu0 %vm5752_vm2, %v6932_v34  ;;  %3943 = vmatprep.mubr.msk.f32.mxu1 %vm5752_vm2, %v6932_v34 }
 0x13f   :  { %4970 = vmatpush3.bf16.msra.mxu0 %v6052_v9  ;;  %4994 = vmatpush3.bf16.msra.mxu1 %v6054_v12 }
 0x140   :  { %4971 = vmatprep.subr.bf16.mxu0 %v6931_v6  ;;  %4995 = vmatprep.subr.bf16.mxu1 %v6931_v6 }
 0x143   :  { %4973 = vmatpush3.bf16.msra.mxu0 %v6076_v20  ;;  %4997 = vmatpush3.bf16.msra.mxu1 %v6078_v21 }
 0x144   :  { %4974 = vmatprep.subr.bf16.mxu0 %v6931_v6  ;;  %4998 = vmatprep.subr.bf16.mxu1 %v6931_v6 }
 0x147   :  { %4976 = vmatpush3.bf16.msra.mxu0 %v6096_v28  ;;  %5000 = vmatpush3.bf16.msra.mxu1 %v6098_v29 }
 0x148   :  { %4977 = vmatprep.subr.bf16.mxu0 %v6931_v6  ;;  %5001 = vmatprep.subr.bf16.mxu1 %v6931_v6 }
 0x14b   :  { %4979 = vmatpush3.bf16.msra.mxu0 %v6116_v36  ;;  %5003 = vmatpush3.bf16.msra.mxu1 %v6118_v37 }
 0x14c   :  { %4980 = vmatprep.subr.bf16.mxu0 %v6931_v6  ;;  %5004 = vmatprep.subr.bf16.mxu1 %v6931_v6 }
 0x14f   :  { %4982 = vmatpush3.bf16.msra.mxu0 %v6136_v44  ;;  %5006 = vmatpush3.bf16.msra.mxu1 %v6138_v45 }
 0x150   :  { %4983 = vmatprep.subr.bf16.mxu0 %v6931_v6  ;;  %5007 = vmatprep.subr.bf16.mxu1 %v6931_v6 }
 0x153   :  { %4985 = vmatpush3.bf16.msra.mxu0 %v6156_v52  ;;  %5009 = vmatpush3.bf16.msra.mxu1 %v6158_v55 }
 0x154   :  { %4986 = vmatprep.subr.bf16.mxu0 %v6931_v6  ;;  %5010 = vmatprep.subr.bf16.mxu1 %v6931_v6 }
 0x157   :  { %4988 = vmatpush3.bf16.msra.mxu0 %v6176_v62  ;;  %5012 = vmatpush3.bf16.msra.mxu1 %v6178_v63 }
 0x158   :  { %5013 = vmatprep.subr.bf16.mxu0 %v6931_v6  ;;  %5037 = vmatprep.subr.bf16.mxu1 %v6931_v6 }
 0x15a   :  { %3909 = vmatmul.mubr.f32.vlgmr.msra.gmra.mrb[22].mxu0 %v737_v15  ;;  %3944 = vmatmul.mubr.f32.vlgmr.msra.gmra.mrb[22].mxu1 %v737_v15 }
 0x15b   :  { %5015 = vmatpush3.bf16.msra.mxu0 %v5813_v10  ;;  %5039 = vmatpush3.bf16.msra.mxu1 %v5815_v11 }
 0x15c   :  { %5016 = vmatprep.subr.bf16.mxu0 %v6931_v6  ;;  %5040 = vmatprep.subr.bf16.mxu1 %v6931_v6 }
 0x15d   :  { %3978 = vmatprep.mubr.msk.f32.mxu0 %vm5752_vm2, %v6932_v34  ;;  %4013 = vmatprep.mubr.msk.f32.mxu1 %vm5752_vm2, %v6932_v34 }
 0x15f   :  { %5018 = vmatpush3.bf16.msra.mxu0 %v5840_v18  ;;  %5042 = vmatpush3.bf16.msra.mxu1 %v5842_v19 }
 0x160   :  { %5019 = vmatprep.subr.bf16.mxu0 %v6931_v6  ;;  %5043 = vmatprep.subr.bf16.mxu1 %v6931_v6 }
 0x163   :  { %5021 = vmatpush3.bf16.msra.mxu0 %v5867_v25  ;;  %5045 = vmatpush3.bf16.msra.mxu1 %v5869_v26 }
 0x164   :  { %5022 = vmatprep.subr.bf16.mxu0 %v6931_v6  ;;  %5046 = vmatprep.subr.bf16.mxu1 %v6931_v6 }
 0x167   :  { %5024 = vmatpush3.bf16.msra.mxu0 %v5894_v32  ;;  %5048 = vmatpush3.bf16.msra.mxu1 %v5896_v33 }
 0x168   :  { %5025 = vmatprep.subr.bf16.mxu0 %v6931_v6  ;;  %5049 = vmatprep.subr.bf16.mxu1 %v6931_v6 }
 0x16b   :  { %5027 = vmatpush3.bf16.msra.mxu0 %v5921_v39  ;;  %5051 = vmatpush3.bf16.msra.mxu1 %v5923_v40 }
 0x16c   :  { %5028 = vmatprep.subr.bf16.mxu0 %v6931_v6  ;;  %5052 = vmatprep.subr.bf16.mxu1 %v6931_v6 }
 0x16f   :  { %5030 = vmatpush3.bf16.msra.mxu0 %v5948_v46  ;;  %5054 = vmatpush3.bf16.msra.mxu1 %v5950_v47 }
 0x170   :  { %5031 = vmatprep.subr.bf16.mxu0 %v6931_v6  ;;  %5055 = vmatprep.subr.bf16.mxu1 %v6931_v6 }
 0x173   :  { %5033 = vmatpush3.bf16.msra.mxu0 %v5975_v53  ;;  %5057 = vmatpush3.bf16.msra.mxu1 %v5977_v54 }
 0x174   :  { %5034 = vmatprep.subr.bf16.mxu0 %v6931_v6  ;;  %5058 = vmatprep.subr.bf16.mxu1 %v6931_v6 }
 0x177   :  { %5036 = vmatpush3.bf16.msra.mxu0 %v6002_v60  ;;  %5060 = vmatpush3.bf16.msra.mxu1 %v6004_v61 }
 0x178   :  { %5061 = vmatprep.subr.bf16.mxu0 %v6931_v6  ;;  %5085 = vmatprep.subr.bf16.mxu1 %v6931_v6 }
 0x20d   :  { %v811_v42 = vpop.f32.mrb[20].mxu0  ;;  %v888_v50 = vpop.f32.mrb[20].mxu1 }
 0x20e   :  { %v815_v8 = vadd.f32 %v811_v42, %v6239_v35  ;;  %v892_v17 = vadd.f32 %v888_v50, %v6244_v43  ;;  %v3840_v23 = vpop.f32.mrb[21].mxu0  ;;  %v3875_v27 = vpop.f32.mrb[21].mxu1 }
 0x210   :  { %v3083_v58 = vmul.f32 -1.442695, %v892_v17  ;;  %v3082_v49 = vmul.f32 -1.442695, %v815_v8 }
 0x212   :  { %5634 = vpow2.f32 %v3083_v58 }
 0x213   :  { %5636 = vpow2.f32 %v3082_v49 }
 0x21c   :  { %v5635_v7 = vpop.eup %5634 }
 0x21d   :  { %v5637_v16 = vpop.eup %5636  ;;  %v896_v31 = vadd.f32 1.0, %v5635_v7 }
 0x21e   :  { %v819_v14 = vadd.f32 1.0, %v5637_v16 }
 0x21f   :  { %5638 = vrcp.f32 %v896_v31 }
 0x220   :  { %5640 = vrcp.f32 %v819_v14 }
 0x229   :  { %v5639_v30 = vpop.eup %5638 }
 0x22a   :  { %v5641_v1 = vpop.eup %5640  ;;  %v1048_v42 = vmul.f32 %v5639_v30, %v6315_v24 }
 0x22d   :  { %v965_v41 = vpop.f32.mrb[22].mxu0  ;;  %v1037_v5 = vpop.f32.mrb[22].mxu1 }
 0x22e   :  { %v969_v2 = vadd.f32 %v965_v41, %v6242_v38  ;;  %v1041_v13 = vadd.f32 %v1037_v5, %v6247_v48  ;;  %v3910_v35 = vpop.f32.mrb[23].mxu0  ;;  %v3945_v22 = vpop.f32.mrb[23].mxu1 }
 0x230   :  { %5642 = vtanh.f32 %v969_v2  ;;  %v3084_v43 = vmul.f32 -1.442695, %v1041_v13 }
 0x232   :  { %5644 = vpow2.f32 %v3084_v43 }
 0x23a   :  { %v5643_v15 = vpop.eup %5642 }
 0x23b   :  { %v1049_v50 = vmul.f32 %v5643_v15, %v5641_v1 }
 0x23c   :  { %v5645_v8 = vpop.eup %5644 }
 0x23d   :  { %v6395_v17 = vadd.f32 %v1049_v50, %v1048_v42  ;;  %v1045_v23 = vadd.f32 1.0, %v5645_v8 }
 0x23f   :  { %5646 = vtanh.f32 %v6395_v17 }
 0x240   :  { %5648 = vrcp.f32 %v1045_v23 }
 0x249   :  { %v5647_v38 = vpop.eup %5646 }
 0x24a   :  { %v5649_v48 = vpop.eup %5648 }
 0x24b   :  { %v1052_v27 = vmul.f32 %v5649_v48, %v5647_v38 }
 0x24d   :  { %3979 = vmatmul.mubr.f32.vlgmr.msra.gmra.mrb[24].mxu0 %v1052_v27  ;;  %4014 = vmatmul.mubr.f32.vlgmr.msra.gmra.mrb[24].mxu1 %v1052_v27 }
 0x24e   :  { %5063 = vmatpush3.bf16.msra.mxu0 %v6026_v3  ;;  %5087 = vmatpush3.bf16.msra.mxu1 %v6028_v4 }
 0x24f   :  { %5064 = vmatprep.subr.bf16.mxu0 %v6931_v6  ;;  %5088 = vmatprep.subr.bf16.mxu1 %v6931_v6 }
 0x250   :  { %4048 = vmatprep.mubr.msk.f32.mxu0 %vm5752_vm2, %v6932_v34  ;;  %4083 = vmatprep.mubr.msk.f32.mxu1 %vm5752_vm2, %v6932_v34 }
 0x252   :  { %5066 = vmatpush3.bf16.msra.mxu0 %v6052_v9  ;;  %5090 = vmatpush3.bf16.msra.mxu1 %v6054_v12 }
 0x253   :  { %5067 = vmatprep.subr.bf16.mxu0 %v6931_v6  ;;  %5091 = vmatprep.subr.bf16.mxu1 %v6931_v6 }
 0x256   :  { %5069 = vmatpush3.bf16.msra.mxu0 %v6076_v20  ;;  %5093 = vmatpush3.bf16.msra.mxu1 %v6078_v21 }
 0x257   :  { %5070 = vmatprep.subr.bf16.mxu0 %v6931_v6  ;;  %5094 = vmatprep.subr.bf16.mxu1 %v6931_v6 }
 0x25a   :  { %5072 = vmatpush3.bf16.msra.mxu0 %v6096_v28  ;;  %5096 = vmatpush3.bf16.msra.mxu1 %v6098_v29 }
 0x25b   :  { %5073 = vmatprep.subr.bf16.mxu0 %v6931_v6  ;;  %5097 = vmatprep.subr.bf16.mxu1 %v6931_v6 }
 0x25e   :  { %5075 = vmatpush3.bf16.msra.mxu0 %v6116_v36  ;;  %5099 = vmatpush3.bf16.msra.mxu1 %v6118_v37 }
 0x25f   :  { %5076 = vmatprep.subr.bf16.mxu0 %v6931_v6  ;;  %5100 = vmatprep.subr.bf16.mxu1 %v6931_v6 }
 0x262   :  { %5078 = vmatpush3.bf16.msra.mxu0 %v6136_v44  ;;  %5102 = vmatpush3.bf16.msra.mxu1 %v6138_v45 }
 0x263   :  { %5079 = vmatprep.subr.bf16.mxu0 %v6931_v6  ;;  %5103 = vmatprep.subr.bf16.mxu1 %v6931_v6 }
 0x266   :  { %5081 = vmatpush3.bf16.msra.mxu0 %v6156_v52  ;;  %5105 = vmatpush3.bf16.msra.mxu1 %v6158_v55 }
 0x267   :  { %5082 = vmatprep.subr.bf16.mxu0 %v6931_v6  ;;  %5106 = vmatprep.subr.bf16.mxu1 %v6931_v6 }
 0x26a   :  { %5084 = vmatpush3.bf16.msra.mxu0 %v6176_v62  ;;  %5108 = vmatpush3.bf16.msra.mxu1 %v6178_v63 }
 0x26b   :  { %5109 = vmatprep.subr.bf16.mxu0 %v6931_v6  ;;  %5133 = vmatprep.subr.bf16.mxu1 %v6931_v6 }
 0x26d   :  { %4049 = vmatmul.mubr.f32.vlgmr.msra.gmra.mrb[26].mxu0 %v1052_v27  ;;  %4084 = vmatmul.mubr.f32.vlgmr.msra.gmra.mrb[26].mxu1 %v1052_v27 }
 0x26e   :  { %5111 = vmatpush3.bf16.msra.mxu0 %v5813_v10  ;;  %5135 = vmatpush3.bf16.msra.mxu1 %v5815_v11 }
 0x26f   :  { %5112 = vmatprep.subr.bf16.mxu0 %v6931_v6  ;;  %5136 = vmatprep.subr.bf16.mxu1 %v6931_v6 }
 0x270   :  { %4118 = vmatprep.mubr.msk.f32.mxu0 %vm5752_vm2, %v6932_v34  ;;  %4153 = vmatprep.mubr.msk.f32.mxu1 %vm5752_vm2, %v6932_v34 }
 0x272   :  { %5114 = vmatpush3.bf16.msra.mxu0 %v5840_v18  ;;  %5138 = vmatpush3.bf16.msra.mxu1 %v5842_v19 }
 0x273   :  { %5115 = vmatprep.subr.bf16.mxu0 %v6931_v6  ;;  %5139 = vmatprep.subr.bf16.mxu1 %v6931_v6 }
 0x276   :  { %5117 = vmatpush3.bf16.msra.mxu0 %v5867_v25  ;;  %5141 = vmatpush3.bf16.msra.mxu1 %v5869_v26 }
 0x277   :  { %5118 = vmatprep.subr.bf16.mxu0 %v6931_v6  ;;  %5142 = vmatprep.subr.bf16.mxu1 %v6931_v6 }
 0x27a   :  { %5120 = vmatpush3.bf16.msra.mxu0 %v5894_v32  ;;  %5144 = vmatpush3.bf16.msra.mxu1 %v5896_v33 }
 0x27b   :  { %5121 = vmatprep.subr.bf16.mxu0 %v6931_v6  ;;  %5145 = vmatprep.subr.bf16.mxu1 %v6931_v6 }
 0x27e   :  { %5123 = vmatpush3.bf16.msra.mxu0 %v5921_v39  ;;  %5147 = vmatpush3.bf16.msra.mxu1 %v5923_v40 }
 0x27f   :  { %5124 = vmatprep.subr.bf16.mxu0 %v6931_v6  ;;  %5148 = vmatprep.subr.bf16.mxu1 %v6931_v6 }
 0x282   :  { %5126 = vmatpush3.bf16.msra.mxu0 %v5948_v46  ;;  %5150 = vmatpush3.bf16.msra.mxu1 %v5950_v47 }
 0x283   :  { %5127 = vmatprep.subr.bf16.mxu0 %v6931_v6  ;;  %5151 = vmatprep.subr.bf16.mxu1 %v6931_v6 }
 0x286   :  { %5129 = vmatpush3.bf16.msra.mxu0 %v5975_v53  ;;  %5153 = vmatpush3.bf16.msra.mxu1 %v5977_v54 }
 0x287   :  { %5130 = vmatprep.subr.bf16.mxu0 %v6931_v6  ;;  %5154 = vmatprep.subr.bf16.mxu1 %v6931_v6 }
 0x28a   :  { %5132 = vmatpush3.bf16.msra.mxu0 %v6002_v60  ;;  %5156 = vmatpush3.bf16.msra.mxu1 %v6004_v61 }
 0x28b   :  { %5157 = vmatprep.subr.bf16.mxu0 %v6931_v6  ;;  %5181 = vmatprep.subr.bf16.mxu1 %v6931_v6 }
 0x320   :  { %v1126_v24 = vpop.f32.mrb[24].mxu0  ;;  %v1203_v58 = vpop.f32.mrb[24].mxu1 }
 0x321   :  { %v1130_v49 = vadd.f32 %v1126_v24, %v6249_v51  ;;  %v1207_v7 = vadd.f32 %v1203_v58, %v6254_v59  ;;  %v3980_v16 = vpop.f32.mrb[25].mxu0  ;;  %v4015_v31 = vpop.f32.mrb[25].mxu1 }
 0x322   :  { %v6934_v31 = vld [vmem:[#allocation7_spill] sm:$0xff] }
 0x323   :  { %v3086_v14 = vmul.f32 -1.442695, %v1207_v7  ;;  %v3085_v41 = vmul.f32 -1.442695, %v1130_v49  ;;  %v6933_v7 = vld [vmem:[#allocation5_spill] sm:$0xff] }
 0x325   :  { %5650 = vpow2.f32 %v3086_v14 }
 0x326   :  { %5652 = vpow2.f32 %v3085_v41 }
 0x32f   :  { %v5651_v5 = vpop.eup %5650 }
 0x330   :  { %v5653_v2 = vpop.eup %5652  ;;  %v1211_v13 = vadd.f32 1.0, %v5651_v5 }
 0x331   :  { %v1134_v35 = vadd.f32 1.0, %v5653_v2 }
 0x332   :  { %5654 = vrcp.f32 %v1211_v13 }
 0x333   :  { %5656 = vrcp.f32 %v1134_v35 }
 0x33c   :  { %v5655_v42 = vpop.eup %5654 }
 0x33d   :  { %v5657_v50 = vpop.eup %5656  ;;  %v1363_v23 = vmul.f32 %v5655_v42, %v6395_v17  ;;  %v6936_v42 = vld [vmem:[#allocation8_spill] sm:$0xff] }
 0x340   :  { %v1280_v22 = vpop.f32.mrb[26].mxu0  ;;  %v1352_v43 = vpop.f32.mrb[26].mxu1 }
 0x341   :  { %v1284_v30 = vadd.f32 %v1280_v22, %v6252_v56  ;;  %v1356_v1 = vadd.f32 %v1352_v43, %v6257_v0  ;;  %v4050_v51 = vpop.f32.mrb[27].mxu0  ;;  %v4085_v15 = vpop.f32.mrb[27].mxu1 }
 0x342   :  { %v6935_v15 = vld [vmem:[#allocation6_spill] sm:$0xff] }
 0x343   :  { %5658 = vtanh.f32 %v1284_v30  ;;  %v3087_v59 = vmul.f32 -1.442695, %v1356_v1 }
 0x345   :  { %5660 = vpow2.f32 %v3087_v59 }
 0x34d   :  { %v5659_v8 = vpop.eup %5658 }
 0x34e   :  { %v1364_v38 = vmul.f32 %v5659_v8, %v5657_v50 }
 0x34f   :  { %v5661_v48 = vpop.eup %5660 }
 0x350   :  { %v6475_v27 = vadd.f32 %v1364_v38, %v1363_v23  ;;  %v1360_v24 = vadd.f32 1.0, %v5661_v48 }
 0x352   :  { %5662 = vtanh.f32 %v6475_v27 }
 0x353   :  { %5664 = vrcp.f32 %v1360_v24 }
 0x35c   :  { %v5663_v56 = vpop.eup %5662 }
 0x35d   :  { %v5665_v0 = vpop.eup %5664 }
 0x35e   :  { %v1367_v58 = vmul.f32 %v5665_v0, %v5663_v56 }
 0x360   :  { %4119 = vmatmul.mubr.f32.vlgmr.msra.gmra.mrb[28].mxu0 %v1367_v58  ;;  %4154 = vmatmul.mubr.f32.vlgmr.msra.gmra.mrb[28].mxu1 %v1367_v58 }
 0x361   :  { %5159 = vmatpush3.bf16.msra.mxu0 %v6026_v3  ;;  %5183 = vmatpush3.bf16.msra.mxu1 %v6028_v4 }
 0x362   :  { %5160 = vmatprep.subr.bf16.mxu0 %v6931_v6  ;;  %5184 = vmatprep.subr.bf16.mxu1 %v6931_v6 }
 0x363   :  { %4188 = vmatprep.mubr.msk.f32.mxu0 %vm5752_vm2, %v6932_v34  ;;  %4223 = vmatprep.mubr.msk.f32.mxu1 %vm5752_vm2, %v6932_v34 }
 0x365   :  { %5162 = vmatpush3.bf16.msra.mxu0 %v6052_v9  ;;  %5186 = vmatpush3.bf16.msra.mxu1 %v6054_v12 }
 0x366   :  { %5163 = vmatprep.subr.bf16.mxu0 %v6931_v6  ;;  %5187 = vmatprep.subr.bf16.mxu1 %v6931_v6 }
 0x369   :  { %5165 = vmatpush3.bf16.msra.mxu0 %v6076_v20  ;;  %5189 = vmatpush3.bf16.msra.mxu1 %v6078_v21 }
 0x36a   :  { %5166 = vmatprep.subr.bf16.mxu0 %v6931_v6  ;;  %5190 = vmatprep.subr.bf16.mxu1 %v6931_v6 }
 0x36d   :  { %5168 = vmatpush3.bf16.msra.mxu0 %v6096_v28  ;;  %5192 = vmatpush3.bf16.msra.mxu1 %v6098_v29 }
 0x36e   :  { %5169 = vmatprep.subr.bf16.mxu0 %v6931_v6  ;;  %5193 = vmatprep.subr.bf16.mxu1 %v6931_v6 }
 0x371   :  { %5171 = vmatpush3.bf16.msra.mxu0 %v6116_v36  ;;  %5195 = vmatpush3.bf16.msra.mxu1 %v6118_v37 }
 0x372   :  { %5172 = vmatprep.subr.bf16.mxu0 %v6931_v6  ;;  %5196 = vmatprep.subr.bf16.mxu1 %v6931_v6 }
 0x375   :  { %5174 = vmatpush3.bf16.msra.mxu0 %v6136_v44  ;;  %5198 = vmatpush3.bf16.msra.mxu1 %v6138_v45 }
 0x376   :  { %5175 = vmatprep.subr.bf16.mxu0 %v6931_v6  ;;  %5199 = vmatprep.subr.bf16.mxu1 %v6931_v6 }
 0x379   :  { %5177 = vmatpush3.bf16.msra.mxu0 %v6156_v52  ;;  %5201 = vmatpush3.bf16.msra.mxu1 %v6158_v55 }
 0x37a   :  { %5178 = vmatprep.subr.bf16.mxu0 %v6931_v6  ;;  %5202 = vmatprep.subr.bf16.mxu1 %v6931_v6 }
 0x37d   :  { %5180 = vmatpush3.bf16.msra.mxu0 %v6176_v62  ;;  %5204 = vmatpush3.bf16.msra.mxu1 %v6178_v63 }
 0x37e   :  { %5205 = vmatprep.subr.bf16.mxu0 %v6931_v6  ;;  %5229 = vmatprep.subr.bf16.mxu1 %v6931_v6 }
 0x380   :  { %4189 = vmatmul.mubr.f32.vlgmr.msra.gmra.mrb[30].mxu0 %v1367_v58  ;;  %4224 = vmatmul.mubr.f32.vlgmr.msra.gmra.mrb[30].mxu1 %v1367_v58 }
 0x381   :  { %5207 = vmatpush3.bf16.msra.mxu0 %v5813_v10  ;;  %5231 = vmatpush3.bf16.msra.mxu1 %v5815_v11 }
 0x382   :  { %5208 = vmatprep.subr.bf16.mxu0 %v6931_v6  ;;  %5232 = vmatprep.subr.bf16.mxu1 %v6931_v6 }
 0x383   :  { %4258 = vmatprep.mubr.msk.f32.mxu0 %vm5752_vm2, %v6932_v34  ;;  %4293 = vmatprep.mubr.msk.f32.mxu1 %vm5752_vm2, %v6932_v34 }
 0x385   :  { %5210 = vmatpush3.bf16.msra.mxu0 %v5840_v18  ;;  %5234 = vmatpush3.bf16.msra.mxu1 %v5842_v19 }
 0x386   :  { %5211 = vmatprep.subr.bf16.mxu0 %v6931_v6  ;;  %5235 = vmatprep.subr.bf16.mxu1 %v6931_v6 }
 0x389   :  { %5213 = vmatpush3.bf16.msra.mxu0 %v5867_v25  ;;  %5237 = vmatpush3.bf16.msra.mxu1 %v5869_v26 }
 0x38a   :  { %5214 = vmatprep.subr.bf16.mxu0 %v6931_v6  ;;  %5238 = vmatprep.subr.bf16.mxu1 %v6931_v6 }
 0x38d   :  { %5216 = vmatpush3.bf16.msra.mxu0 %v5894_v32  ;;  %5240 = vmatpush3.bf16.msra.mxu1 %v5896_v33 }
 0x38e   :  { %5217 = vmatprep.subr.bf16.mxu0 %v6931_v6  ;;  %5241 = vmatprep.subr.bf16.mxu1 %v6931_v6 }
 0x391   :  { %5219 = vmatpush3.bf16.msra.mxu0 %v5921_v39  ;;  %5243 = vmatpush3.bf16.msra.mxu1 %v5923_v40 }
 0x392   :  { %5220 = vmatprep.subr.bf16.mxu0 %v6931_v6  ;;  %5244 = vmatprep.subr.bf16.mxu1 %v6931_v6 }
 0x395   :  { %5222 = vmatpush3.bf16.msra.mxu0 %v5948_v46  ;;  %5246 = vmatpush3.bf16.msra.mxu1 %v5950_v47 }
 0x396   :  { %5223 = vmatprep.subr.bf16.mxu0 %v6931_v6  ;;  %5247 = vmatprep.subr.bf16.mxu1 %v6931_v6 }
 0x399   :  { %5225 = vmatpush3.bf16.msra.mxu0 %v5975_v53  ;;  %5249 = vmatpush3.bf16.msra.mxu1 %v5977_v54 }
 0x39a   :  { %5226 = vmatprep.subr.bf16.mxu0 %v6931_v6  ;;  %5250 = vmatprep.subr.bf16.mxu1 %v6931_v6 }
 0x39d   :  { %5228 = vmatpush3.bf16.msra.mxu0 %v6002_v60  ;;  %5252 = vmatpush3.bf16.msra.mxu1 %v6004_v61 }
 0x39e   :  { %5253 = vmatprep.subr.bf16.mxu0 %v6931_v6  ;;  %5277 = vmatprep.subr.bf16.mxu1 %v6931_v6 }
 0x433   :  { %v1441_v17 = vpop.f32.mrb[28].mxu0  ;;  %v1518_v49 = vpop.f32.mrb[28].mxu1 }
 0x434   :  { %v1445_v16 = vadd.f32 %v1441_v17, %v6933_v7  ;;  %v1522_v14 = vadd.f32 %v1518_v49, %v6934_v31  ;;  %v4120_v41 = vpop.f32.mrb[29].mxu0  ;;  %v4155_v5 = vpop.f32.mrb[29].mxu1 }
 0x435   :  { %v6937_v5 = vld [vmem:[#allocation9_spill] sm:$0xff] }
 0x436   :  { %v3089_v2 = vmul.f32 -1.442695, %v1522_v14  ;;  %v3088_v13 = vmul.f32 -1.442695, %v1445_v16 }
 0x438   :  { %5666 = vpow2.f32 %v3089_v2 }
 0x439   :  { %5668 = vpow2.f32 %v3088_v13  ;;  %v6938_v13 = vld [vmem:[#allocation11_spill] sm:$0xff] }
 0x442   :  { %v5667_v35 = vpop.eup %5666 }
 0x443   :  { %v5669_v22 = vpop.eup %5668  ;;  %v1526_v43 = vadd.f32 1.0, %v5667_v35 }
 0x444   :  { %v1449_v30 = vadd.f32 1.0, %v5669_v22 }
 0x445   :  { %5670 = vrcp.f32 %v1526_v43 }
 0x446   :  { %5672 = vrcp.f32 %v1449_v30 }
 0x44f   :  { %v5671_v48 = vpop.eup %5670 }
 0x450   :  { %v5673_v24 = vpop.eup %5672  ;;  %v1678_v0 = vmul.f32 %v5671_v48, %v6475_v27  ;;  %v6940_v48 = vld [vmem:[#allocation12_spill] sm:$0xff] }
 0x453   :  { %v1595_v1 = vpop.f32.mrb[30].mxu0  ;;  %v1667_v51 = vpop.f32.mrb[30].mxu1 }
 0x454   :  { %v1599_v59 = vadd.f32 %v1595_v1, %v6935_v15  ;;  %v1671_v50 = vadd.f32 %v1667_v51, %v6936_v42  ;;  %v4190_v8 = vpop.f32.mrb[31].mxu0  ;;  %v4225_v23 = vpop.f32.mrb[31].mxu1 }
 0x455   :  { %v6939_v23 = vld [vmem:[#allocation10_spill] sm:$0xff] }
 0x456   :  { %5674 = vtanh.f32 %v1599_v59  ;;  %v3090_v38 = vmul.f32 -1.442695, %v1671_v50 }
 0x458   :  { %5676 = vpow2.f32 %v3090_v38 }
 0x460   :  { %v5675_v56 = vpop.eup %5674 }
 0x461   :  { %v1679_v58 = vmul.f32 %v5675_v56, %v5673_v24 }
 0x462   :  { %v5677_v17 = vpop.eup %5676 }
 0x463   :  { %v6555_v49 = vadd.f32 %v1679_v58, %v1678_v0  ;;  %v1675_v7 = vadd.f32 1.0, %v5677_v17 }
 0x465   :  { %5678 = vtanh.f32 %v6555_v49 }
 0x466   :  { %5680 = vrcp.f32 %v1675_v7 }
 0x46f   :  { %v5679_v16 = vpop.eup %5678 }
 0x470   :  { %v5681_v31 = vpop.eup %5680 }
 0x471   :  { %v1682_v14 = vmul.f32 %v5681_v31, %v5679_v16 }
 0x473   :  { %4259 = vmatmul.mubr.f32.vlgmr.msra.gmra.mrb[32].mxu0 %v1682_v14  ;;  %4294 = vmatmul.mubr.f32.vlgmr.msra.gmra.mrb[32].mxu1 %v1682_v14 }
 0x474   :  { %5255 = vmatpush3.bf16.msra.mxu0 %v6026_v3  ;;  %5279 = vmatpush3.bf16.msra.mxu1 %v6028_v4 }
 0x475   :  { %5256 = vmatprep.subr.bf16.mxu0 %v6931_v6  ;;  %5280 = vmatprep.subr.bf16.mxu1 %v6931_v6 }
 0x476   :  { %4328 = vmatprep.mubr.msk.f32.mxu0 %vm5752_vm2, %v6932_v34  ;;  %4363 = vmatprep.mubr.msk.f32.mxu1 %vm5752_vm2, %v6932_v34 }
 0x478   :  { %5258 = vmatpush3.bf16.msra.mxu0 %v6052_v9  ;;  %5282 = vmatpush3.bf16.msra.mxu1 %v6054_v12 }
 0x479   :  { %5259 = vmatprep.subr.bf16.mxu0 %v6931_v6  ;;  %5283 = vmatprep.subr.bf16.mxu1 %v6931_v6 }
 0x47c   :  { %5261 = vmatpush3.bf16.msra.mxu0 %v6076_v20  ;;  %5285 = vmatpush3.bf16.msra.mxu1 %v6078_v21 }
 0x47d   :  { %5262 = vmatprep.subr.bf16.mxu0 %v6931_v6  ;;  %5286 = vmatprep.subr.bf16.mxu1 %v6931_v6 }
 0x480   :  { %5264 = vmatpush3.bf16.msra.mxu0 %v6096_v28  ;;  %5288 = vmatpush3.bf16.msra.mxu1 %v6098_v29 }
 0x481   :  { %5265 = vmatprep.subr.bf16.mxu0 %v6931_v6  ;;  %5289 = vmatprep.subr.bf16.mxu1 %v6931_v6 }
 0x484   :  { %5267 = vmatpush3.bf16.msra.mxu0 %v6116_v36  ;;  %5291 = vmatpush3.bf16.msra.mxu1 %v6118_v37 }
 0x485   :  { %5268 = vmatprep.subr.bf16.mxu0 %v6931_v6  ;;  %5292 = vmatprep.subr.bf16.mxu1 %v6931_v6 }
 0x488   :  { %5270 = vmatpush3.bf16.msra.mxu0 %v6136_v44  ;;  %5294 = vmatpush3.bf16.msra.mxu1 %v6138_v45 }
 0x489   :  { %5271 = vmatprep.subr.bf16.mxu0 %v6931_v6  ;;  %5295 = vmatprep.subr.bf16.mxu1 %v6931_v6 }
 0x48c   :  { %5273 = vmatpush3.bf16.msra.mxu0 %v6156_v52  ;;  %5297 = vmatpush3.bf16.msra.mxu1 %v6158_v55 }
 0x48d   :  { %5274 = vmatprep.subr.bf16.mxu0 %v6931_v6  ;;  %5298 = vmatprep.subr.bf16.mxu1 %v6931_v6 }
 0x490   :  { %5276 = vmatpush3.bf16.msra.mxu0 %v6176_v62  ;;  %5300 = vmatpush3.bf16.msra.mxu1 %v6178_v63 }
 0x491   :  { %5301 = vmatprep.subr.bf16.mxu0 %v6931_v6  ;;  %5325 = vmatprep.subr.bf16.mxu1 %v6931_v6 }
 0x493   :  { %4329 = vmatmul.mubr.f32.vlgmr.msra.gmra.mrb[34].mxu0 %v1682_v14  ;;  %4364 = vmatmul.mubr.f32.vlgmr.msra.gmra.mrb[34].mxu1 %v1682_v14 }
 0x494   :  { %5303 = vmatpush3.bf16.msra.mxu0 %v5813_v10  ;;  %5327 = vmatpush3.bf16.msra.mxu1 %v5815_v11 }
 0x495   :  { %5304 = vmatprep.subr.bf16.mxu0 %v6931_v6  ;;  %5328 = vmatprep.subr.bf16.mxu1 %v6931_v6 }
 0x496   :  { %4398 = vmatprep.mubr.msk.f32.mxu0 %vm5752_vm2, %v6932_v34  ;;  %4433 = vmatprep.mubr.msk.f32.mxu1 %vm5752_vm2, %v6932_v34 }
 0x498   :  { %5306 = vmatpush3.bf16.msra.mxu0 %v5840_v18  ;;  %5330 = vmatpush3.bf16.msra.mxu1 %v5842_v19 }
 0x499   :  { %5307 = vmatprep.subr.bf16.mxu0 %v6931_v6  ;;  %5331 = vmatprep.subr.bf16.mxu1 %v6931_v6 }
 0x49c   :  { %5309 = vmatpush3.bf16.msra.mxu0 %v5867_v25  ;;  %5333 = vmatpush3.bf16.msra.mxu1 %v5869_v26 }
 0x49d   :  { %5310 = vmatprep.subr.bf16.mxu0 %v6931_v6  ;;  %5334 = vmatprep.subr.bf16.mxu1 %v6931_v6 }
 0x4a0   :  { %5312 = vmatpush3.bf16.msra.mxu0 %v5894_v32  ;;  %5336 = vmatpush3.bf16.msra.mxu1 %v5896_v33 }
 0x4a1   :  { %5313 = vmatprep.subr.bf16.mxu0 %v6931_v6  ;;  %5337 = vmatprep.subr.bf16.mxu1 %v6931_v6 }
 0x4a4   :  { %5315 = vmatpush3.bf16.msra.mxu0 %v5921_v39  ;;  %5339 = vmatpush3.bf16.msra.mxu1 %v5923_v40 }
 0x4a5   :  { %5316 = vmatprep.subr.bf16.mxu0 %v6931_v6  ;;  %5340 = vmatprep.subr.bf16.mxu1 %v6931_v6 }
 0x4a8   :  { %5318 = vmatpush3.bf16.msra.mxu0 %v5948_v46  ;;  %5342 = vmatpush3.bf16.msra.mxu1 %v5950_v47 }
 0x4a9   :  { %5319 = vmatprep.subr.bf16.mxu0 %v6931_v6  ;;  %5343 = vmatprep.subr.bf16.mxu1 %v6931_v6 }
 0x4ac   :  { %5321 = vmatpush3.bf16.msra.mxu0 %v5975_v53  ;;  %5345 = vmatpush3.bf16.msra.mxu1 %v5977_v54 }
 0x4ad   :  { %5322 = vmatprep.subr.bf16.mxu0 %v6931_v6  ;;  %5346 = vmatprep.subr.bf16.mxu1 %v6931_v6 }
 0x4b0   :  { %5324 = vmatpush3.bf16.msra.mxu0 %v6002_v60  ;;  %5348 = vmatpush3.bf16.msra.mxu1 %v6004_v61 }
 0x4b1   :  { %5349 = vmatprep.subr.bf16.mxu0 %v6931_v6  ;;  %5373 = vmatprep.subr.bf16.mxu1 %v6931_v6 }
 0x546   :  { %v1756_v27 = vpop.f32.mrb[32].mxu0  ;;  %v1833_v41 = vpop.f32.mrb[32].mxu1 }
 0x547   :  { %v1760_v2 = vadd.f32 %v1756_v27, %v6937_v5  ;;  %v1837_v35 = vadd.f32 %v1833_v41, %v6938_v13  ;;  %v4260_v22 = vpop.f32.mrb[33].mxu0  ;;  %v4295_v43 = vpop.f32.mrb[33].mxu1 }
 0x548   :  { %v6941_v43 = vld [vmem:[#allocation13_spill] sm:$0xff] }
 0x549   :  { %v3092_v30 = vmul.f32 -1.442695, %v1837_v35  ;;  %v3091_v1 = vmul.f32 -1.442695, %v1760_v2 }
 0x54b   :  { %5682 = vpow2.f32 %v3092_v30 }
 0x54c   :  { %5684 = vpow2.f32 %v3091_v1  ;;  %v6942_v1 = vld [vmem:[#allocation15_spill] sm:$0xff] }
 0x555   :  { %v5683_v51 = vpop.eup %5682 }
 0x556   :  { %v5685_v15 = vpop.eup %5684  ;;  %v1841_v59 = vadd.f32 1.0, %v5683_v51 }
 0x557   :  { %v1764_v42 = vadd.f32 1.0, %v5685_v15 }
 0x558   :  { %5686 = vrcp.f32 %v1841_v59 }
 0x559   :  { %5688 = vrcp.f32 %v1764_v42 }
 0x562   :  { %v5687_v17 = vpop.eup %5686 }
 0x563   :  { %v5689_v7 = vpop.eup %5688  ;;  %v1993_v31 = vmul.f32 %v5687_v17, %v6555_v49  ;;  %v6944_v17 = vld [vmem:[#allocation16_spill] sm:$0xff] }
 0x566   :  { %v1910_v50 = vpop.f32.mrb[34].mxu0  ;;  %v1982_v8 = vpop.f32.mrb[34].mxu1 }
 0x567   :  { %v1914_v38 = vadd.f32 %v1910_v50, %v6939_v23  ;;  %v1986_v24 = vadd.f32 %v1982_v8, %v6940_v48  ;;  %v4330_v56 = vpop.f32.mrb[35].mxu0  ;;  %v4365_v0 = vpop.f32.mrb[35].mxu1 }
 0x568   :  { %v6943_v0 = vld [vmem:[#allocation14_spill] sm:$0xff] }
 0x569   :  { %5690 = vtanh.f32 %v1914_v38  ;;  %v3093_v58 = vmul.f32 -1.442695, %v1986_v24 }
 0x56b   :  { %5692 = vpow2.f32 %v3093_v58 }
 0x573   :  { %v5691_v16 = vpop.eup %5690 }
 0x574   :  { %v1994_v14 = vmul.f32 %v5691_v16, %v5689_v7 }
 0x575   :  { %v5693_v27 = vpop.eup %5692 }
 0x576   :  { %v6635_v41 = vadd.f32 %v1994_v14, %v1993_v31  ;;  %v1990_v5 = vadd.f32 1.0, %v5693_v27 }
 0x578   :  { %5694 = vtanh.f32 %v6635_v41 }
 0x579   :  { %5696 = vrcp.f32 %v1990_v5 }
 0x582   :  { %v5695_v2 = vpop.eup %5694 }
 0x583   :  { %v5697_v13 = vpop.eup %5696 }
 0x584   :  { %v1997_v35 = vmul.f32 %v5697_v13, %v5695_v2 }
 0x586   :  { %4399 = vmatmul.mubr.f32.vlgmr.msra.gmra.mrb[36].mxu0 %v1997_v35  ;;  %4434 = vmatmul.mubr.f32.vlgmr.msra.gmra.mrb[36].mxu1 %v1997_v35 }
 0x587   :  { %5351 = vmatpush3.bf16.msra.mxu0 %v6026_v3  ;;  %5375 = vmatpush3.bf16.msra.mxu1 %v6028_v4 }
 0x588   :  { %5352 = vmatprep.subr.bf16.mxu0 %v6931_v6  ;;  %5376 = vmatprep.subr.bf16.mxu1 %v6931_v6 }
 0x589   :  { %4468 = vmatprep.mubr.msk.f32.mxu0 %vm5752_vm2, %v6932_v34  ;;  %4503 = vmatprep.mubr.msk.f32.mxu1 %vm5752_vm2, %v6932_v34 }
 0x58b   :  { %5354 = vmatpush3.bf16.msra.mxu0 %v6052_v9  ;;  %5378 = vmatpush3.bf16.msra.mxu1 %v6054_v12 }
 0x58c   :  { %5355 = vmatprep.subr.bf16.mxu0 %v6931_v6  ;;  %5379 = vmatprep.subr.bf16.mxu1 %v6931_v6 }
 0x58f   :  { %5357 = vmatpush3.bf16.msra.mxu0 %v6076_v20  ;;  %5381 = vmatpush3.bf16.msra.mxu1 %v6078_v21 }
 0x590   :  { %5358 = vmatprep.subr.bf16.mxu0 %v6931_v6  ;;  %5382 = vmatprep.subr.bf16.mxu1 %v6931_v6 }
 0x593   :  { %5360 = vmatpush3.bf16.msra.mxu0 %v6096_v28  ;;  %5384 = vmatpush3.bf16.msra.mxu1 %v6098_v29 }
 0x594   :  { %5361 = vmatprep.subr.bf16.mxu0 %v6931_v6  ;;  %5385 = vmatprep.subr.bf16.mxu1 %v6931_v6 }
 0x597   :  { %5363 = vmatpush3.bf16.msra.mxu0 %v6116_v36  ;;  %5387 = vmatpush3.bf16.msra.mxu1 %v6118_v37 }
 0x598   :  { %5364 = vmatprep.subr.bf16.mxu0 %v6931_v6  ;;  %5388 = vmatprep.subr.bf16.mxu1 %v6931_v6 }
 0x59b   :  { %5366 = vmatpush3.bf16.msra.mxu0 %v6136_v44  ;;  %5390 = vmatpush3.bf16.msra.mxu1 %v6138_v45 }
 0x59c   :  { %5367 = vmatprep.subr.bf16.mxu0 %v6931_v6  ;;  %5391 = vmatprep.subr.bf16.mxu1 %v6931_v6 }
 0x59f   :  { %5369 = vmatpush3.bf16.msra.mxu0 %v6156_v52  ;;  %5393 = vmatpush3.bf16.msra.mxu1 %v6158_v55 }
 0x5a0   :  { %5370 = vmatprep.subr.bf16.mxu0 %v6931_v6  ;;  %5394 = vmatprep.subr.bf16.mxu1 %v6931_v6 }
 0x5a3   :  { %5372 = vmatpush3.bf16.msra.mxu0 %v6176_v62  ;;  %5396 = vmatpush3.bf16.msra.mxu1 %v6178_v63 }
 0x5a4   :  { %5397 = vmatprep.subr.bf16.mxu0 %v6931_v6  ;;  %5421 = vmatprep.subr.bf16.mxu1 %v6931_v6 }
 0x5a6   :  { %4469 = vmatmul.mubr.f32.vlgmr.msra.gmra.mrb[38].mxu0 %v1997_v35  ;;  %4504 = vmatmul.mubr.f32.vlgmr.msra.gmra.mrb[38].mxu1 %v1997_v35 }
 0x5a7   :  { %5399 = vmatpush3.bf16.msra.mxu0 %v5813_v10  ;;  %5423 = vmatpush3.bf16.msra.mxu1 %v5815_v11 }
 0x5a8   :  { %5400 = vmatprep.subr.bf16.mxu0 %v6931_v6  ;;  %5424 = vmatprep.subr.bf16.mxu1 %v6931_v6 }
 0x5a9   :  { %4538 = vmatprep.mubr.msk.f32.mxu0 %vm5752_vm2, %v6932_v34  ;;  %4573 = vmatprep.mubr.msk.f32.mxu1 %vm5752_vm2, %v6932_v34 }
 0x5ab   :  { %5402 = vmatpush3.bf16.msra.mxu0 %v5840_v18  ;;  %5426 = vmatpush3.bf16.msra.mxu1 %v5842_v19 }
 0x5ac   :  { %5403 = vmatprep.subr.bf16.mxu0 %v6931_v6  ;;  %5427 = vmatprep.subr.bf16.mxu1 %v6931_v6 }
 0x5af   :  { %5405 = vmatpush3.bf16.msra.mxu0 %v5867_v25  ;;  %5429 = vmatpush3.bf16.msra.mxu1 %v5869_v26 }
 0x5b0   :  { %5406 = vmatprep.subr.bf16.mxu0 %v6931_v6  ;;  %5430 = vmatprep.subr.bf16.mxu1 %v6931_v6 }
 0x5b3   :  { %5408 = vmatpush3.bf16.msra.mxu0 %v5894_v32  ;;  %5432 = vmatpush3.bf16.msra.mxu1 %v5896_v33 }
 0x5b4   :  { %5409 = vmatprep.subr.bf16.mxu0 %v6931_v6  ;;  %5433 = vmatprep.subr.bf16.mxu1 %v6931_v6 }
 0x5b7   :  { %5411 = vmatpush3.bf16.msra.mxu0 %v5921_v39  ;;  %5435 = vmatpush3.bf16.msra.mxu1 %v5923_v40 }
 0x5b8   :  { %5412 = vmatprep.subr.bf16.mxu0 %v6931_v6  ;;  %5436 = vmatprep.subr.bf16.mxu1 %v6931_v6 }
 0x5bb   :  { %5414 = vmatpush3.bf16.msra.mxu0 %v5948_v46  ;;  %5438 = vmatpush3.bf16.msra.mxu1 %v5950_v47 }
 0x5bc   :  { %5415 = vmatprep.subr.bf16.mxu0 %v6931_v6  ;;  %5439 = vmatprep.subr.bf16.mxu1 %v6931_v6 }
 0x5bf   :  { %5417 = vmatpush3.bf16.msra.mxu0 %v5975_v53  ;;  %5441 = vmatpush3.bf16.msra.mxu1 %v5977_v54 }
 0x5c0   :  { %5418 = vmatprep.subr.bf16.mxu0 %v6931_v6  ;;  %5442 = vmatprep.subr.bf16.mxu1 %v6931_v6 }
 0x5c3   :  { %5420 = vmatpush3.bf16.msra.mxu0 %v6002_v60  ;;  %5444 = vmatpush3.bf16.msra.mxu1 %v6004_v61 }
 0x5c4   :  { %5445 = vmatprep.subr.bf16.mxu0 %v6931_v6  ;;  %5469 = vmatprep.subr.bf16.mxu1 %v6931_v6 }
 0x659   :  { %v2071_v49 = vpop.f32.mrb[36].mxu0  ;;  %v2148_v22 = vpop.f32.mrb[36].mxu1 }
 0x65a   :  { %v2075_v30 = vadd.f32 %v2071_v49, %v6941_v43  ;;  %v2152_v51 = vadd.f32 %v2148_v22, %v6942_v1  ;;  %v4400_v15 = vpop.f32.mrb[37].mxu0  ;;  %v4435_v59 = vpop.f32.mrb[37].mxu1 }
 0x65b   :  { %v6948_v59 = vld [vmem:[#allocation20_spill] sm:$0xff] }
 0x65c   :  { %v3095_v42 = vmul.f32 -1.442695, %v2152_v51  ;;  %v3094_v50 = vmul.f32 -1.442695, %v2075_v30 }
 0x65e   :  { %5698 = vpow2.f32 %v3095_v42 }
 0x65f   :  { %5700 = vpow2.f32 %v3094_v50 }
 0x668   :  { %v5699_v8 = vpop.eup %5698 }
 0x669   :  { %v5701_v23 = vpop.eup %5700  ;;  %v2156_v38 = vadd.f32 1.0, %v5699_v8 }
 0x66a   :  { %v2079_v48 = vadd.f32 1.0, %v5701_v23 }
 0x66b   :  { %5702 = vrcp.f32 %v2156_v38 }
 0x66c   :  { %5704 = vrcp.f32 %v2079_v48 }
 0x675   :  { %v5703_v27 = vpop.eup %5702 }
 0x676   :  { %v5705_v5 = vpop.eup %5704  ;;  %v2308_v13 = vmul.f32 %v5703_v27, %v6635_v41  ;;  %v6947_v41 = vld [vmem:[#allocation18_spill] sm:$0xff] }
 0x679   :  { %v2225_v24 = vpop.f32.mrb[38].mxu0  ;;  %v2297_v56 = vpop.f32.mrb[38].mxu1 }
 0x67a   :  { %v2229_v58 = vadd.f32 %v2225_v24, %v6943_v0  ;;  %v2301_v7 = vadd.f32 %v2297_v56, %v6944_v17  ;;  %v4470_v16 = vpop.f32.mrb[39].mxu0  ;;  %v4505_v31 = vpop.f32.mrb[39].mxu1 }
 0x67c   :  { %5706 = vtanh.f32 %v2229_v58  ;;  %v3096_v14 = vmul.f32 -1.442695, %v2301_v7 }
 0x67e   :  { %5708 = vpow2.f32 %v3096_v14 }
 0x686   :  { %v5707_v2 = vpop.eup %5706 }
 0x687   :  { %v2309_v35 = vmul.f32 %v5707_v2, %v5705_v5  ;;  %v2960_v5 = vld [vmem:[%s6905_s4 + $0x60] sm:$0xff]  ;;  %v2961_v2 = vld [vmem:[%s6905_s4 + $0x68] sm:$0xff] }
 0x688   :  { %v5709_v49 = vpop.eup %5708 }
 0x689   :  { %v6715_v22 = vadd.f32 %v2309_v35, %v2308_v13  ;;  %v2305_v43 = vadd.f32 1.0, %v5709_v49  ;;  %v5608_v13 = vpack.c.bf16 %v2961_v2, %v2960_v5  ;;  %v2962_v35 = vld [vmem:[%s6905_s4 + $0x70] sm:$0xff]  ;;  %v2963_v49 = vld [vmem:[%s6905_s4 + $0x78] sm:$0xff] }
 0x68b   :  { %5710 = vtanh.f32 %v6715_v22 }
 0x68c   :  { %5712 = vrcp.f32 %v2305_v43 }
 0x695   :  { %v5711_v30 = vpop.eup %5710 }
 0x696   :  { %v5713_v1 = vpop.eup %5712 }
 0x697   :  { %v2312_v51 = vmul.f32 %v5713_v1, %v5711_v30  ;;  %v6949_v1 = vld [vmem:[#allocation21_spill] sm:$0xff] }
 0x699   :  { %4539 = vmatmul.mubr.f32.vlgmr.msra.gmra.mrb[40].mxu0 %v2312_v51  ;;  %4574 = vmatmul.mubr.f32.vlgmr.msra.gmra.mrb[40].mxu1 %v2312_v51 }
 0x69a   :  { %5447 = vmatpush3.bf16.msra.mxu0 %v6026_v3  ;;  %5471 = vmatpush3.bf16.msra.mxu1 %v6028_v4 }
 0x69b   :  { %5448 = vmatprep.subr.bf16.mxu0 %v6931_v6  ;;  %5472 = vmatprep.subr.bf16.mxu1 %v6931_v6 }
 0x69c   :  { %4608 = vmatprep.mubr.msk.f32.mxu0 %vm5752_vm2, %v6932_v34  ;;  %4643 = vmatprep.mubr.msk.f32.mxu1 %vm5752_vm2, %v6932_v34 }
 0x69e   :  { %5450 = vmatpush3.bf16.msra.mxu0 %v6052_v9  ;;  %5474 = vmatpush3.bf16.msra.mxu1 %v6054_v12 }
 0x69f   :  { %5451 = vmatprep.subr.bf16.mxu0 %v6931_v6  ;;  %5475 = vmatprep.subr.bf16.mxu1 %v6931_v6 }
 0x6a2   :  { %5453 = vmatpush3.bf16.msra.mxu0 %v6076_v20  ;;  %5477 = vmatpush3.bf16.msra.mxu1 %v6078_v21 }
 0x6a3   :  { %5454 = vmatprep.subr.bf16.mxu0 %v6931_v6  ;;  %5478 = vmatprep.subr.bf16.mxu1 %v6931_v6 }
 0x6a6   :  { %5456 = vmatpush3.bf16.msra.mxu0 %v6096_v28  ;;  %5480 = vmatpush3.bf16.msra.mxu1 %v6098_v29 }
 0x6a7   :  { %5457 = vmatprep.subr.bf16.mxu0 %v6931_v6  ;;  %5481 = vmatprep.subr.bf16.mxu1 %v6931_v6 }
 0x6aa   :  { %5459 = vmatpush3.bf16.msra.mxu0 %v6116_v36  ;;  %5483 = vmatpush3.bf16.msra.mxu1 %v6118_v37 }
 0x6ab   :  { %5460 = vmatprep.subr.bf16.mxu0 %v6931_v6  ;;  %5484 = vmatprep.subr.bf16.mxu1 %v6931_v6 }
 0x6ae   :  { %5462 = vmatpush3.bf16.msra.mxu0 %v6136_v44  ;;  %5486 = vmatpush3.bf16.msra.mxu1 %v6138_v45 }
 0x6af   :  { %5463 = vmatprep.subr.bf16.mxu0 %v6931_v6  ;;  %5487 = vmatprep.subr.bf16.mxu1 %v6931_v6 }
 0x6b2   :  { %5465 = vmatpush3.bf16.msra.mxu0 %v6156_v52  ;;  %5489 = vmatpush3.bf16.msra.mxu1 %v6158_v55 }
 0x6b3   :  { %5466 = vmatprep.subr.bf16.mxu0 %v6931_v6  ;;  %5490 = vmatprep.subr.bf16.mxu1 %v6931_v6 }
 0x6b6   :  { %5468 = vmatpush3.bf16.msra.mxu0 %v6176_v62  ;;  %5492 = vmatpush3.bf16.msra.mxu1 %v6178_v63 }
 0x6b7   :  { %5493 = vmatprep.subr.bf16.mxu0 %v6931_v6  ;;  %5517 = vmatprep.subr.bf16.mxu1 %v6931_v6 }
 0x6b9   :  { %4609 = vmatmul.mubr.f32.vlgmr.msra.gmra.mrb[42].mxu0 %v2312_v51  ;;  %4644 = vmatmul.mubr.f32.vlgmr.msra.gmra.mrb[42].mxu1 %v2312_v51 }
 0x6ba   :  { %5495 = vmatpush3.bf16.msra.mxu0 %v5813_v10  ;;  %5519 = vmatpush3.bf16.msra.mxu1 %v5815_v11 }
 0x6bb   :  { %5496 = vmatprep.subr.bf16.mxu0 %v6931_v6  ;;  %5520 = vmatprep.subr.bf16.mxu1 %v6931_v6 }
 0x6bc   :  { %4678 = vmatprep.mubr.msk.f32.mxu0 %vm5752_vm2, %v6932_v34  ;;  %4713 = vmatprep.mubr.msk.f32.mxu1 %vm5752_vm2, %v6932_v34 }
 0x6be   :  { %5498 = vmatpush3.bf16.msra.mxu0 %v5840_v18  ;;  %5522 = vmatpush3.bf16.msra.mxu1 %v5842_v19  ;;  %v6945_v18 = vld [vmem:[#allocation17_spill] sm:$0xff] }
 0x6bf   :  { %5499 = vmatprep.subr.bf16.mxu0 %v6931_v6  ;;  %5523 = vmatprep.subr.bf16.mxu1 %v6931_v6 }
 0x6c2   :  { %5501 = vmatpush3.bf16.msra.mxu0 %v5867_v25  ;;  %5525 = vmatpush3.bf16.msra.mxu1 %v5869_v26  ;;  %v6946_v25 = vld [vmem:[#allocation19_spill] sm:$0xff] }
 0x6c3   :  { %5502 = vmatprep.subr.bf16.mxu0 %v6931_v6  ;;  %5526 = vmatprep.subr.bf16.mxu1 %v6931_v6 }
 0x6c6   :  { %5504 = vmatpush3.bf16.msra.mxu0 %v5894_v32  ;;  %5528 = vmatpush3.bf16.msra.mxu1 %v5896_v33 }
 0x6c7   :  { %5505 = vmatprep.subr.bf16.mxu0 %v6931_v6  ;;  %5529 = vmatprep.subr.bf16.mxu1 %v6931_v6 }
 0x6ca   :  { %5507 = vmatpush3.bf16.msra.mxu0 %v5921_v39  ;;  %5531 = vmatpush3.bf16.msra.mxu1 %v5923_v40 }
 0x6cb   :  { %5508 = vmatprep.subr.bf16.mxu0 %v6931_v6  ;;  %5532 = vmatprep.subr.bf16.mxu1 %v6931_v6 }
 0x6ce   :  { %5510 = vmatpush3.bf16.msra.mxu0 %v5948_v46  ;;  %5534 = vmatpush3.bf16.msra.mxu1 %v5950_v47 }
 0x6cf   :  { %5511 = vmatprep.subr.bf16.mxu0 %v6931_v6  ;;  %5535 = vmatprep.subr.bf16.mxu1 %v6931_v6 }
 0x6d2   :  { %5513 = vmatpush3.bf16.msra.mxu0 %v5975_v53  ;;  %5537 = vmatpush3.bf16.msra.mxu1 %v5977_v54 }
 0x6d3   :  { %5514 = vmatprep.subr.bf16.mxu0 %v6931_v6  ;;  %5538 = vmatprep.subr.bf16.mxu1 %v6931_v6 }
 0x6d6   :  { %5516 = vmatpush3.bf16.msra.mxu0 %v6002_v60  ;;  %5540 = vmatpush3.bf16.msra.mxu1 %v6004_v61 }
 0x6d7   :  { %5541 = vmatprep.subr.bf16.mxu0 %v6931_v6  ;;  %5565 = vmatprep.subr.bf16.mxu1 %v6931_v6 }
 0x76c   :  { %v2386_v10 = vpop.f32.mrb[40].mxu0  ;;  %v2463_v11 = vpop.f32.mrb[40].mxu1 }
 0x76d   :  { %v2390_v19 = vadd.f32 %v2386_v10, %v6945_v18  ;;  %v2467_v26 = vadd.f32 %v2463_v11, %v6946_v25  ;;  %v4540_v32 = vpop.f32.mrb[41].mxu0  ;;  %v4575_v33 = vpop.f32.mrb[41].mxu1  ;;  %v6950_v10 = vld [vmem:[#allocation23_spill] sm:$0xff] }
 0x76f   :  { %v3098_v39 = vmul.f32 -1.442695, %v2467_v26  ;;  %v3097_v40 = vmul.f32 -1.442695, %v2390_v19 }
 0x771   :  { %5714 = vpow2.f32 %v3098_v39 }
 0x772   :  { %5716 = vpow2.f32 %v3097_v40 }
 0x77b   :  { %v5715_v46 = vpop.eup %5714 }
 0x77c   :  { %v5717_v47 = vpop.eup %5716  ;;  %v2471_v53 = vadd.f32 1.0, %v5715_v46 }
 0x77d   :  { %v2394_v54 = vadd.f32 1.0, %v5717_v47 }
 0x77e   :  { %5718 = vrcp.f32 %v2471_v53 }
 0x77f   :  { %5720 = vrcp.f32 %v2394_v54 }
 0x788   :  { %v5719_v38 = vpop.eup %5718 }
 0x789   :  { %v5721_v48 = vpop.eup %5720  ;;  %v2623_v56 = vmul.f32 %v5719_v38, %v6715_v22  ;;  %v5611_v22 = vpack.c.bf16 %v2963_v49, %v2962_v35 }
 0x78c   :  { %v2540_v60 = vpop.f32.mrb[42].mxu0  ;;  %v2612_v61 = vpop.f32.mrb[42].mxu1 }
 0x78d   :  { %v2544_v15 = vadd.f32 %v2540_v60, %v6947_v41  ;;  %v2616_v42 = vadd.f32 %v2612_v61, %v6948_v59  ;;  %v4610_v50 = vpop.f32.mrb[43].mxu0  ;;  %v4645_v8 = vpop.f32.mrb[43].mxu1 }
 0x78f   :  { %5722 = vtanh.f32 %v2544_v15  ;;  %v3099_v23 = vmul.f32 -1.442695, %v2616_v42 }
 0x791   :  { %5724 = vpow2.f32 %v3099_v23 }
 0x799   :  { %v5723_v24 = vpop.eup %5722 }
 0x79a   :  { %v2624_v0 = vmul.f32 %v5723_v24, %v5721_v48 }
 0x79b   :  { %v5725_v58 = vpop.eup %5724 }
 0x79c   :  { %v6795_v17 = vadd.f32 %v2624_v0, %v2623_v56  ;;  %v2620_v7 = vadd.f32 1.0, %v5725_v58  ;;  %v3103_v0 = vld [vmem:[%s6906_s5] ss:$0 sm:$0xff] }
 0x79e   :  { %5726 = vtanh.f32 %v6795_v17 }
 0x79f   :  { %5728 = vrcp.f32 %v2620_v7 }
 0x7a8   :  { %v5727_v16 = vpop.eup %5726 }
 0x7a9   :  { %v5729_v31 = vpop.eup %5728 }
 0x7aa   :  { %v2627_v14 = vmul.f32 %v5729_v31, %v5727_v16 }
 0x7ac   :  { %4679 = vmatmul.mubr.f32.vlgmr.msra.gmra.mrb[44].mxu0 %v2627_v14  ;;  %4714 = vmatmul.mubr.f32.vlgmr.msra.gmra.mrb[44].mxu1 %v2627_v14 }
 0x7ad   :  { %5543 = vmatpush3.bf16.msra.mxu0 %v6026_v3  ;;  %5567 = vmatpush3.bf16.msra.mxu1 %v6028_v4  ;;  %v2948_v3 = vld [vmem:[%s6905_s4] sm:$0xff]  ;;  %v2949_v4 = vld [vmem:[%s6905_s4 + $0x8] sm:$0xff] }
 0x7ae   :  { %5544 = vmatprep.subr.bf16.mxu0 %v6931_v6  ;;  %5568 = vmatprep.subr.bf16.mxu1 %v6931_v6 }
 0x7af   :  { %4748 = vmatprep.mubr.msk.f32.mxu0 %vm5752_vm2, %v6932_v34  ;;  %4783 = vmatprep.mubr.msk.f32.mxu1 %vm5752_vm2, %v6932_v34 }
 0x7b1   :  { %5546 = vmatpush3.bf16.msra.mxu0 %v6052_v9  ;;  %5570 = vmatpush3.bf16.msra.mxu1 %v6054_v12  ;;  %v5590_v9 = vpack.c.bf16 %v2949_v4, %v2948_v3  ;;  %v2950_v12 = vld [vmem:[%s6905_s4 + $0x10] sm:$0xff] }
 0x7b2   :  { %5547 = vmatprep.subr.bf16.mxu0 %v6931_v6  ;;  %5571 = vmatprep.subr.bf16.mxu1 %v6931_v6 }
 0x7b5   :  { %5549 = vmatpush3.bf16.msra.mxu0 %v6076_v20  ;;  %5573 = vmatpush3.bf16.msra.mxu1 %v6078_v21  ;;  %v2951_v20 = vld [vmem:[%s6905_s4 + $0x18] sm:$0xff] }
 0x7b6   :  { %5550 = vmatprep.subr.bf16.mxu0 %v6931_v6  ;;  %5574 = vmatprep.subr.bf16.mxu1 %v6931_v6  ;;  %v5593_v21 = vpack.c.bf16 %v2951_v20, %v2950_v12 }
 0x7b9   :  { %5552 = vmatpush3.bf16.msra.mxu0 %v6096_v28  ;;  %5576 = vmatpush3.bf16.msra.mxu1 %v6098_v29  ;;  %v2952_v28 = vld [vmem:[%s6905_s4 + $0x20] sm:$0xff]  ;;  %v2953_v29 = vld [vmem:[%s6905_s4 + $0x28] sm:$0xff] }
 0x7ba   :  { %5553 = vmatprep.subr.bf16.mxu0 %v6931_v6  ;;  %5577 = vmatprep.subr.bf16.mxu1 %v6931_v6 }
 0x7bd   :  { %5555 = vmatpush3.bf16.msra.mxu0 %v6116_v36  ;;  %5579 = vmatpush3.bf16.msra.mxu1 %v6118_v37  ;;  %v5596_v36 = vpack.c.bf16 %v2953_v29, %v2952_v28  ;;  %v2954_v37 = vld [vmem:[%s6905_s4 + $0x30] sm:$0xff] }
 0x7be   :  { %5556 = vmatprep.subr.bf16.mxu0 %v6931_v6  ;;  %5580 = vmatprep.subr.bf16.mxu1 %v6931_v6 }
 0x7c1   :  { %5558 = vmatpush3.bf16.msra.mxu0 %v6136_v44  ;;  %5582 = vmatpush3.bf16.msra.mxu1 %v6138_v45  ;;  %v2955_v44 = vld [vmem:[%s6905_s4 + $0x38] sm:$0xff] }
 0x7c2   :  { %5559 = vmatprep.subr.bf16.mxu0 %v6931_v6  ;;  %5583 = vmatprep.subr.bf16.mxu1 %v6931_v6  ;;  %v5599_v45 = vpack.c.bf16 %v2955_v44, %v2954_v37 }
 0x7c5   :  { %5561 = vmatpush3.bf16.msra.mxu0 %v6156_v52  ;;  %5585 = vmatpush3.bf16.msra.mxu1 %v6158_v55  ;;  %v2956_v52 = vld [vmem:[%s6905_s4 + $0x40] sm:$0xff]  ;;  %v2957_v55 = vld [vmem:[%s6905_s4 + $0x48] sm:$0xff] }
 0x7c6   :  { %5562 = vmatprep.subr.bf16.mxu0 %v6931_v6  ;;  %5586 = vmatprep.subr.bf16.mxu1 %v6931_v6 }
 0x7c9   :  { %5564 = vmatpush3.bf16.msra.mxu0 %v6176_v62  ;;  %5588 = vmatpush3.bf16.msra.mxu1 %v6178_v63  ;;  %v5602_v62 = vpack.c.bf16 %v2957_v55, %v2956_v52  ;;  %v2958_v63 = vld [vmem:[%s6905_s4 + $0x50] sm:$0xff] }
 0x7ca   :  { %5589 = vmatprep.subr.bf16.mxu0 %v6931_v6 }
 0x7cc   :  { %4749 = vmatmul.mubr.f32.vlgmr.msra.gmra.mrb[46].mxu0 %v2627_v14  ;;  %4784 = vmatmul.mubr.f32.vlgmr.msra.gmra.mrb[46].mxu1 %v2627_v14 }
 0x7cd   :  { %4818 = vmatprep.mubr.msk.f32.mxu0 %vm5752_vm2, %v6932_v34  ;;  %5591 = vmatpush3.bf16.msra.mxu0 %v5590_v9  ;;  %v2959_v34 = vld [vmem:[%s6905_s4 + $0x58] sm:$0xff] }
 0x7ce   :  { %5592 = vmatprep.subr.bf16.mxu0 %v6931_v6  ;;  %v5605_v27 = vpack.c.bf16 %v2959_v34, %v2958_v63 }
 0x7d1   :  { %5594 = vmatpush3.bf16.msra.mxu0 %v5593_v21 }
 0x7d2   :  { %5595 = vmatprep.subr.bf16.mxu0 %v6931_v6 }
 0x7d5   :  { %5597 = vmatpush3.bf16.msra.mxu0 %v5596_v36 }
 0x7d6   :  { %5598 = vmatprep.subr.bf16.mxu0 %v6931_v6 }
 0x7d9   :  { %5600 = vmatpush3.bf16.msra.mxu0 %v5599_v45 }
 0x7da   :  { %5601 = vmatprep.subr.bf16.mxu0 %v6931_v6 }
 0x7dd   :  { %5603 = vmatpush3.bf16.msra.mxu0 %v5602_v62 }
 0x7de   :  { %5604 = vmatprep.subr.bf16.mxu0 %v6931_v6 }
 0x7e1   :  { %5606 = vmatpush3.bf16.msra.mxu0 %v5605_v27 }
 0x7e2   :  { %5607 = vmatprep.subr.bf16.mxu0 %v6931_v6 }
 0x7e5   :  { %5609 = vmatpush3.bf16.msra.mxu0 %v5608_v13 }
 0x7e6   :  { %5610 = vmatprep.subr.bf16.mxu0 %v6931_v6  ;;  %v6951_v6 = vld [vmem:[#allocation22_spill] sm:$0xff] }
 0x7e9   :  { %5612 = vmatpush3.bf16.msra.mxu0 %v5611_v22 }
 0x87f   :  { %v2701_v43 = vpop.f32.mrb[44].mxu0  ;;  %v2778_v30 = vpop.f32.mrb[44].mxu1 }
 0x880   :  { %v2705_v51 = vadd.f32 %v2701_v43, %v6949_v1  ;;  %v2782_v11 = vadd.f32 %v2778_v30, %v6950_v10  ;;  %v4680_v18 = vpop.f32.mrb[45].mxu0  ;;  %v4715_v19 = vpop.f32.mrb[45].mxu1 }
 0x882   :  { %v3101_v25 = vmul.f32 -1.442695, %v2782_v11  ;;  %v3100_v26 = vmul.f32 -1.442695, %v2705_v51 }
 0x884   :  { %5730 = vpow2.f32 %v3101_v25 }
 0x885   :  { %5732 = vpow2.f32 %v3100_v26 }
 0x88e   :  { %v5731_v32 = vpop.eup %5730 }
 0x88f   :  { %v5733_v33 = vpop.eup %5732  ;;  %v2786_v39 = vadd.f32 1.0, %v5731_v32 }
 0x890   :  { %v2709_v40 = vadd.f32 1.0, %v5733_v33 }
 0x891   :  { %5734 = vrcp.f32 %v2786_v39 }
 0x892   :  { %5736 = vrcp.f32 %v2709_v40 }
 0x89b   :  { %v5735_v15 = vpop.eup %5734 }
 0x89c   :  { %v5737_v59 = vpop.eup %5736  ;;  %v2938_v50 = vmul.f32 %v5735_v15, %v6795_v17 }
 0x89f   :  { %v2855_v46 = vpop.f32.mrb[46].mxu0  ;;  %v2927_v47 = vpop.f32.mrb[46].mxu1 }
 0x8a0   :  { %v2859_v53 = vadd.f32 %v2855_v46, %v6951_v6  ;;  %v2931_v54 = vadd.f32 %v2927_v47, %v6307_v57  ;;  %v4750_v60 = vpop.f32.mrb[47].mxu0  ;;  %v4785_v61 = vpop.f32.mrb[47].mxu1 }
 0x8a2   :  { %5738 = vtanh.f32 %v2859_v53  ;;  %v3102_v41 = vmul.f32 -1.442695, %v2931_v54 }
 0x8a4   :  { %5740 = vpow2.f32 %v3102_v41 }
 0x8ac   :  { %v5739_v42 = vpop.eup %5738 }
 0x8ad   :  { %v2939_v8 = vmul.f32 %v5739_v42, %v5737_v59 }
 0x8ae   :  { %v5741_v23 = vpop.eup %5740 }
 0x8af   :  { %v2940_v38 = vadd.f32 %v2939_v8, %v2938_v50  ;;  %v2935_v48 = vadd.f32 1.0, %v5741_v23 }
 0x8b1   :  { %5742 = vtanh.f32 %v2940_v38 }
 0x8b2   :  { %5744 = vrcp.f32 %v2935_v48 }
 0x8bb   :  { %v5743_v24 = vpop.eup %5742 }
 0x8bc   :  { %v5745_v56 = vpop.eup %5744 }
 0x8bd   :  { %v2942_v57 = vmul.f32 %v5745_v56, %v5743_v24 }
 0x8bf   :  { %4819 = vmatmul.mubr.f32.vlgmr.msra.gmra.mrb[48].mxu0 %v2942_v57 }
 0x992   :  { %v3037_v58 = vpop.f32.mrb[48].mxu0 }
 0x993   :  { %v3038_v7 = vadd.f32 %v3103_v0, %v3037_v58  ;;  %v4820_v16 = vpop.f32.mrb[49].mxu0 }
 0x995   :  { %v3104_v31 = vmul.f32 -1.442695, %v3038_v7 }
 0x997   :  { %5746 = vpow2.f32 %v3104_v31 }
 0x9a1   :  { %v5747_v17 = vpop.eup %5746 }
 0x9a2   :  { %v3044_v14 = vadd.f32 1.0, %v5747_v17 }
 0x9a4   :  { %5748 = vrcp.f32 %v3044_v14 }
 0x9ae   :  { %v5749_v3 = vpop.eup %5748 }
 0x9af   :  { %3047 = vst [vmem:[%s6907_s6] sm:$0xff] %v5749_v3 }

</bundles_post_ra>
